<compile_context>
chip_gen: v7x
topology: tpu7x:2x2x1
jax: 0.10.0
libtpu: 0.0.40
codegen_flags: <defaults>
</compile_context>

<pallas_src>
import jax
import jax.numpy as jnp
from jax.experimental import pallas as pl
from jax.experimental.pallas import tpu as pltpu


# --------------------------------------------------------------------------
# kernels
# --------------------------------------------------------------------------

def _fused_kernel(zt_ref, bias_ref, r_ref, w1_ref, w2_ref, b2_ref, out_ref):
    """Whole forward in one VMEM-resident call (small-model fast path):
         h   = SiLU(zt @ W1 + bias)     bias = t*wt + cond@Wc + b1 (precomputed)
         v   = h @ W2 + b2
         out = per-sample sum((r - v)^2),   r = z1 - x (precomputed)
    """
    pre = jnp.dot(zt_ref[...], w1_ref[...],
                  preferred_element_type=jnp.float32) + bias_ref[...]
    h = (pre * jax.nn.sigmoid(pre)).astype(jnp.bfloat16)
    v = jnp.dot(h, w2_ref[...],
                preferred_element_type=jnp.float32) + b2_ref[...]
    diff = r_ref[...] - v
    out_ref[...] = jnp.sum(diff * diff, axis=1, keepdims=True)


def _hidden_kernel(zt_ref, bias_ref, w1_ref, h_ref):
    """First-layer hidden tile: h[:, tile] = SiLU(zt @ W1[:, tile] + bias[:, tile])."""
    pre = jnp.dot(zt_ref[...], w1_ref[...],
                  preferred_element_type=jnp.float32) + bias_ref[...]
    h_ref[...] = (pre * jax.nn.sigmoid(pre)).astype(jnp.bfloat16)


def _output_kernel_acc(h_ref, r_ref, w2_ref, b2_ref, out_ref):
    """Second layer + per-sample SSE, accumulated in the resident output block
    (single-TC chips: 'arbitrary' D axis, no HBM partials / XLA reduction)."""
    @pl.when(pl.program_id(0) == 0)
    def _():
        out_ref[...] = jnp.zeros_like(out_ref)

    v = jnp.dot(h_ref[...], w2_ref[...],
                preferred_element_type=jnp.float32) + b2_ref[...]
    diff = r_ref[...] - v
    out_ref[...] += jnp.sum(diff * diff, axis=1, keepdims=True)


def _output_kernel_par(h_ref, r_ref, w2_ref, b2_ref, psum_ref):
    """Second layer + per-sample SSE partial per D tile ('parallel' D axis so
    v7x megacore shards the W2 stream across its two TensorCores)."""
    v = jnp.dot(h_ref[...], w2_ref[...],
                preferred_element_type=jnp.float32) + b2_ref[...]
    diff = r_ref[...] - v
    psum_ref[...] = jnp.sum(diff * diff, axis=1, keepdims=True)[None, :, :]


# --------------------------------------------------------------------------
# wrapper
# --------------------------------------------------------------------------

def _tpu_vmem_budget():
    """Generation-aware scoped-VMEM budget (bytes) and multicore flag.
       v5e/v6e: 128 MiB physical, 1 TC  -> ~96 MiB budget
       v7x    :  64 MiB per TC,  2 TCs  -> ~48 MiB budget
    """
    try:
        cap = int(pltpu.get_tpu_info().vmem_capacity_bytes)
    except Exception:
        cap = 64 << 20                      # conservative fallback (v7x-sized)
    if cap >= (100 << 20):
        return 96 << 20, False              # v5e / v6e: single TensorCore
    return 48 << 20, True                   # v7x: 2 TensorCores per chip


def _pick_tile(dim, target):
    """Largest multiple of 128 that divides `dim` and is <= target (else dim)."""
    if dim % 128 != 0 or dim <= 128:
        return dim
    t = max(128, (min(int(target), dim) // 128) * 128)
    while t > 128 and dim % t != 0:
        t -= 128
    return t if dim % t == 0 else dim


def rf_forward(x_nchw, cond, t, z1, params, *,
               tile_h=None, tile_d=None, force_tiled=False, loss_partials=None):
    """Pallas-backed RF.forward (given pre-sampled t and z1).

    Returns (loss, batchwise_mse): batchwise_mse[i] = mean over C,H,W of
    (z1 - x - vtheta)^2, matching the PyTorch module.
    """
    B, C, H, W = x_nchw.shape
    D = C * H * W
    w1, b1, wt, wc, w2, b2 = params
    hidden = w1.shape[1]

    budget, multicore = _tpu_vmem_budget()
    vmem_cap = int(budget)

    # ---- XLA-side prep (cheap elementwise / tiny matmul, hoisted out of the
    # Pallas weight-streaming loops) -----------------------------------------
    # Pad batch to the bf16 sublane-packing multiple (16): zt / h are bf16.
    Bp = -(-B // 16) * 16

    def pad_b(a):
        return jnp.pad(a, ((0, Bp - B),) + ((0, 0),) * (a.ndim - 1))

    xf = pad_b(x_nchw.reshape(B, D).astype(jnp.float32))
    z1f = pad_b(z1.reshape(B, D).astype(jnp.float32))
    t2 = pad_b(t.reshape(B, 1).astype(jnp.float32))
    cf = pad_b(cond.astype(jnp.float32))

    # RF interpolation + residual target, computed once (not per hidden tile).
    zt = ((1.0 - t2) * xf + t2 * z1f).astype(jnp.bfloat16)       # [Bp, D] bf16
    r = z1f - xf                                                 # [Bp, D] f32
    # Per-sample first-layer bias: t embedding + cond projection + b1.
    bias = (t2 * wt.reshape(1, hidden).astype(jnp.float32)
            + jnp.dot(cf, wc.astype(jnp.float32))
            + b1.reshape(1, hidden).astype(jnp.float32))         # [Bp, hidden] f32

    # Weights streamed in bf16 (halves HBM weight traffic); f32 MXU accumulate.
    w1b = w1.astype(jnp.bfloat16)
    w2b = w2.astype(jnp.bfloat16)
    b2f = b2.astype(jnp.float32).reshape(1, D)

    # ---- fused single-call fast path ----------------------------------------
    fused_need = (2 * D * hidden * 2            # W1 + W2 (bf16)
                  + Bp * D * (2 + 4 + 8)        # zt + r + v/diff temps
                  + Bp * hidden * (4 + 4 + 2)   # bias + pre + h
                  + D * 4 + Bp * 4)
    if (not force_tiled) and 2 * fused_need <= budget:
        psum = pl.pallas_call(
            _fused_kernel,
            out_shape=jax.ShapeDtypeStruct((Bp, 1), jnp.float32),
            compiler_params=pltpu.CompilerParams(vmem_limit_bytes=vmem_cap),
        )(zt, bias, r, w1b, w2b, b2f)
        batchwise_mse = psum[:B, 0] / D
        return jnp.mean(batchwise_mse), batchwise_mse

    # ---- tiled weight-streaming path ----------------------------------------
    # Tile targets from the VMEM budget: the double-buffered bf16 weight slabs
    # (4 * K * tile bytes each) are the dominant term; keep each within ~1/4 of
    # the budget so residents + outputs fit comfortably.
    if tile_h is None:
        tile_h = _pick_tile(hidden, min(1024, max(256, (budget // 4) // (4 * D))))
    if tile_d is None:
        tile_d = _pick_tile(D, min(2048, max(256, (budget // 4) // (4 * hidden))))

    # On v7x keep >= 2 tiles per 'parallel' axis so neither TensorCore idles.
    if multicore:
        if hidden // tile_h < 2:
            tile_h = _pick_tile(hidden, max(128, hidden // 2))
        if D // tile_d < 2:
            tile_d = _pick_tile(D, max(128, D // 2))

    n_h = hidden // tile_h
    n_d = D // tile_d

    # Resident inputs (constant block index) don't need double buffering.
    resident = pl.Buffered(1)

    # ---- kernel 1: hidden-dim tiles -----------------------------------------
    h = pl.pallas_call(
        _hidden_kernel,
        out_shape=jax.ShapeDtypeStruct((Bp, hidden), jnp.bfloat16),
        grid=(n_h,),
        in_specs=[
            pl.BlockSpec((Bp, D), lambda j: (0, 0),
                         pipeline_mode=resident),                 # zt (resident)
            pl.BlockSpec((Bp, tile_h), lambda j: (0, j)),         # bias tile
            pl.BlockSpec((D, tile_h), lambda j: (0, j)),          # W1 tile (streamed)
        ],
        out_specs=pl.BlockSpec((Bp, tile_h), lambda j: (0, j)),
        compiler_params=pltpu.CompilerParams(
            dimension_semantics=("parallel",),
            vmem_limit_bytes=vmem_cap),
        cost_estimate=pl.CostEstimate(
            flops=2 * Bp * D * hidden,
            transcendentals=Bp * hidden,
            bytes_accessed=D * hidden * 2 + Bp * D * 2 + Bp * hidden * 6),
    )(zt, bias, w1b)

    # ---- kernel 2: output-D tiles + per-sample SSE ---------------------------
    if loss_partials is None:
        loss_partials = "parallel" if (multicore and n_d >= 2) else "accumulate"

    k2_in_specs = [
        pl.BlockSpec((Bp, hidden), lambda j: (0, 0),
                     pipeline_mode=resident),                     # h (resident)
        pl.BlockSpec((Bp, tile_d), lambda j: (0, j)),             # r tile
        pl.BlockSpec((hidden, tile_d), lambda j: (0, j)),         # W2 tile (streamed)
        pl.BlockSpec((1, tile_d), lambda j: (0, j)),              # b2 tile
    ]
    k2_cost = pl.CostEstimate(
        flops=2 * Bp * hidden * D,
        transcendentals=0,
        bytes_accessed=hidden * D * 2 + Bp * D * 4 + Bp * hidden * 2)

    if loss_partials == "accumulate":
        psum = pl.pallas_call(
            _output_kernel_acc,
            out_shape=jax.ShapeDtypeStruct((Bp, 1), jnp.float32),
            grid=(n_d,),
            in_specs=k2_in_specs,
            out_specs=pl.BlockSpec((Bp, 1), lambda j: (0, 0)),
            compiler_params=pltpu.CompilerParams(
                dimension_semantics=("arbitrary",),
                vmem_limit_bytes=vmem_cap),
            cost_estimate=k2_cost,
        )(h, r, w2b, b2f)
        per_sample_sse = psum[:B, 0]
    else:
        psum = pl.pallas_call(
            _output_kernel_par,
            out_shape=jax.ShapeDtypeStruct((n_d, Bp, 1), jnp.float32),
            grid=(n_d,),
            in_specs=k2_in_specs,
            out_specs=pl.BlockSpec((1, Bp, 1), lambda j: (j, 0, 0)),
            compiler_params=pltpu.CompilerParams(
                dimension_semantics=("parallel",),
                vmem_limit_bytes=vmem_cap),
            cost_estimate=k2_cost,
        )(h, r, w2b, b2f)
        per_sample_sse = jnp.sum(psum[:, :B, 0], axis=0)   # tiny reduction in XLA

    batchwise_mse = per_sample_sse / D
    return jnp.mean(batchwise_mse), batchwise_mse


# --------------------------------------------------------------------------
# reference + params
# --------------------------------------------------------------------------

def rf_reference(x_nchw, cond, t, z1, params):
    """Pure-JAX reference with the same bf16 matmul casts as the kernels."""
    B, C, H, W = x_nchw.shape
    D = C * H * W
    w1, b1, wt, wc, w2, b2 = params
    x = x_nchw.reshape(B, D).astype(jnp.float32)
    z1f = z1.reshape(B, D).astype(jnp.float32)
    t2 = t.reshape(B, 1).astype(jnp.float32)
    zt = (1.0 - t2) * x + t2 * z1f
    pre = (jnp.dot(zt.astype(jnp.bfloat16), w1.astype(jnp.bfloat16),
                   preferred_element_type=jnp.float32)
           + t2 * wt + jnp.dot(cond.astype(jnp.float32), wc) + b1)
    h = (pre * jax.nn.sigmoid(pre)).astype(jnp.bfloat16)
    v = jnp.dot(h, w2.astype(jnp.bfloat16),
                preferred_element_type=jnp.float32) + b2
    diff = z1f - x - v
    bmse = jnp.mean(diff * diff, axis=1)
    return jnp.mean(bmse), bmse


def init_params(key, D, hidden, cond_dim):
    k1, k2, k3, k4 = jax.random.split(key, 4)
    w1 = jax.random.normal(k1, (D, hidden), jnp.float32) * (1.0 / jnp.sqrt(D))
    b1 = jnp.zeros((1, hidden), jnp.float32)
    wt = jax.random.normal(k2, (1, hidden), jnp.float32) * 0.02
    wc = jax.random.normal(k3, (cond_dim, hidden), jnp.float32) * (1.0 / jnp.sqrt(cond_dim))
    w2 = jax.random.normal(k4, (hidden, D), jnp.float32) * (1.0 / jnp.sqrt(hidden))
    b2 = jnp.zeros((1, D), jnp.float32)
    return (w1, b1, wt, wc, w2, b2)


if __name__ == "__main__":
    B, C, H, W = 2, 4, 16, 16
    D = C * H * W          # 1024
    hidden = 256
    cond_dim = 8

    key = jax.random.PRNGKey(0)
    kx, kc, kt, kz, kp = jax.random.split(key, 5)

    x = jax.random.normal(kx, (B, C, H, W), jnp.float32)        # NCHW
    cond = jax.random.normal(kc, (B, cond_dim), jnp.float32)

    # RF.forward randomness (ln=True path): t = sigmoid(randn(B)), z1 ~ N(0,1)
    nt = jax.random.normal(kt, (B,), jnp.float32)
    t = jax.nn.sigmoid(nt)
    z1 = jax.random.normal(kz, (B, C, H, W), jnp.float32)

    params = init_params(kp, D, hidden, cond_dim)
    ref_loss, ref_bmse = rf_reference(x, cond, t, z1, params)

    # 1) fused single-call fast path (auto-selected at this model size)
    loss, bmse = rf_forward(x, cond, t, z1, params)
    loss, bmse = jax.block_until_ready((loss, bmse))
    assert bool(jnp.isfinite(loss))
    assert bool(jnp.allclose(bmse, ref_bmse, rtol=2e-2, atol=2e-2)), (bmse, ref_bmse)

    # 2) tiled weight-streaming path, accumulator loss reduction (v5e/v6e style).
    #    Small tiles only to exercise multi-step grids; real sizing is automatic.
    loss_a, bmse_a = rf_forward(x, cond, t, z1, params, force_tiled=True,
                                tile_h=128, tile_d=256, loss_partials="accumulate")
    loss_a, bmse_a = jax.block_until_ready((loss_a, bmse_a))
    assert bool(jnp.allclose(bmse_a, ref_bmse, rtol=2e-2, atol=2e-2)), (bmse_a, ref_bmse)

    # 3) tiled path with 'parallel' partial-sum reduction (v7x megacore style)
    loss_p, bmse_p = rf_forward(x, cond, t, z1, params, force_tiled=True,
                                tile_h=128, tile_d=256, loss_partials="parallel")
    loss_p, bmse_p = jax.block_until_ready((loss_p, bmse_p))
    assert bool(jnp.allclose(bmse_p, ref_bmse, rtol=2e-2, atol=2e-2)), (bmse_p, ref_bmse)

    # ttloss: list of (t_value, per-sample loss) pairs, like the PyTorch code
    ttloss = [(float(tv), float(tl)) for tv, tl in zip(t, bmse)]
    assert len(ttloss) == B

    print("KERNEL_OK")
</pallas_src>

<mosaic_0001>
module attributes {stable_mosaic.version = 11 : i64} {
  func.func @_fused_kernel(%arg0: memref<16x1024xbf16, #tpu.memory_space<vmem>>, %arg1: memref<16x256xf32, #tpu.memory_space<vmem>>, %arg2: memref<16x1024xf32, #tpu.memory_space<vmem>>, %arg3: memref<1024x256xbf16, #tpu.memory_space<vmem>>, %arg4: memref<256x1024xbf16, #tpu.memory_space<vmem>>, %arg5: memref<1x1024xf32, #tpu.memory_space<vmem>>, %arg6: memref<16x1xf32, #tpu.memory_space<vmem>>) attributes {dimension_semantics = [], scalar_prefetch = 0 : i64, scratch_operands = 0 : i64, tpu.core_type = #tpu.core_type<tc>} {
    %c0 = arith.constant 0 : index
    %c0_0 = arith.constant 0 : index
    %0 = vector.load %arg0[%c0, %c0_0] : memref<16x1024xbf16, #tpu.memory_space<vmem>>, vector<16x1024xbf16>
    %c0_1 = arith.constant 0 : index
    %c0_2 = arith.constant 0 : index
    %1 = vector.load %arg3[%c0_1, %c0_2] : memref<1024x256xbf16, #tpu.memory_space<vmem>>, vector<1024x256xbf16>
    %cst = arith.constant dense<0.000000e+00> : vector<16x256xf32>
    %2 = tpu.matmul %0, %1, %cst {dimension_numbers = #tpu.dot_dimension_numbers<[1], [0], [0], [1], [0, 0, 1, 1], [], []>} : vector<16x1024xbf16>, vector<1024x256xbf16>, vector<16x256xf32> -> vector<16x256xf32>
    %c0_3 = arith.constant 0 : index
    %c0_4 = arith.constant 0 : index
    %3 = vector.load %arg1[%c0_3, %c0_4] : memref<16x256xf32, #tpu.memory_space<vmem>>, vector<16x256xf32>
    %4 = arith.addf %2, %3 : vector<16x256xf32>
    %5 = arith.negf %4 : vector<16x256xf32>
    %6 = math.exp %5 : vector<16x256xf32>
    %cst_5 = arith.constant 1.000000e+00 : f32
    %7 = vector.broadcast %cst_5 : f32 to vector<16x256xf32>
    %8 = arith.addf %7, %6 : vector<16x256xf32>
    %9 = arith.divf %7, %8 : vector<16x256xf32>
    %10 = arith.mulf %4, %9 : vector<16x256xf32>
    %11 = arith.truncf %10 : vector<16x256xf32> to vector<16x256xbf16>
    %c0_6 = arith.constant 0 : index
    %c0_7 = arith.constant 0 : index
    %12 = vector.load %arg4[%c0_6, %c0_7] : memref<256x1024xbf16, #tpu.memory_space<vmem>>, vector<256x1024xbf16>
    %cst_8 = arith.constant dense<0.000000e+00> : vector<16x1024xf32>
    %13 = tpu.matmul %11, %12, %cst_8 {dimension_numbers = #tpu.dot_dimension_numbers<[1], [0], [0], [1], [0, 0, 1, 1], [], []>} : vector<16x256xbf16>, vector<256x1024xbf16>, vector<16x1024xf32> -> vector<16x1024xf32>
    %c0_9 = arith.constant 0 : index
    %c0_10 = arith.constant 0 : index
    %14 = vector.load %arg5[%c0_9, %c0_10] : memref<1x1024xf32, #tpu.memory_space<vmem>>, vector<1x1024xf32>
    %15 = vector.broadcast %14 : vector<1x1024xf32> to vector<16x1024xf32>
    %16 = arith.addf %13, %15 : vector<16x1024xf32>
    %c0_11 = arith.constant 0 : index
    %c0_12 = arith.constant 0 : index
    %17 = vector.load %arg2[%c0_11, %c0_12] : memref<16x1024xf32, #tpu.memory_space<vmem>>, vector<16x1024xf32>
    %18 = arith.subf %17, %16 : vector<16x1024xf32>
    %19 = arith.mulf %18, %18 : vector<16x1024xf32>
    %cst_13 = arith.constant dense<0.000000e+00> : vector<16xf32>
    %20 = vector.multi_reduction <add>, %19, %cst_13 [1] : vector<16x1024xf32> to vector<16xf32>
    %21 = vector.shape_cast %20 : vector<16xf32> to vector<16x1xf32>
    %c0_14 = arith.constant 0 : index
    %c0_15 = arith.constant 0 : index
    %22 = vector.load %arg6[%c0_14, %c0_15] : memref<16x1xf32, #tpu.memory_space<vmem>>, vector<16x1xf32>
    tpu.vector_store %arg6[%c0_14, %c0_15], %21 {strides = array<i32>} : memref<16x1xf32, #tpu.memory_space<vmem>>, vector<16x1xf32>,
    return
  }
}

</mosaic_0001>

<bundles_post_ra>
// kernel: tpu_custom_call.1
= control target key start
LH: loop header
LB: loop body
LE: loop exit
PB: predicated region body
PF: predicated region fallthrough
CT: control target
= control target key end

     0   :  { %11 = vsyncpa [#allocation3], 0  ;;  %s2971_s0 = inlined_call_operand.hbm [shape: bf16[16,1024], index: 0, kind: input, shape index: {}]   ;;  %s2972_s1 = inlined_call_operand.hbm [shape: f32[16,256], index: 1, kind: input, shape index: {}]   ;;  %s2973_s2 = inlined_call_operand.hbm [shape: f32[16,1024], index: 2, kind: input, shape index: {}]   ;;  %s2974_s3 = inlined_call_operand.hbm [shape: bf16[1024,256], index: 3, kind: input, shape index: {}]   ;;  %s2975_s4 = inlined_call_operand.hbm [shape: bf16[256,1024], index: 4, kind: input, shape index: {}]   ;;  %s2976_s5 = inlined_call_operand.vmem [shape: f32[1,1024], index: 5, kind: input, shape index: {}]   ;;  %s2977_s6 = inlined_call_operand.vmem [shape: f32[16,1], index: 6, kind: output, shape index: {}]  }
   0x1   :  { %12 = vsyncpa [#allocation5], 0 }
   0x2   :  { %13 = vsyncpa [#allocation8], 0  ;;  %s2792_s21 = smov [#allocation4]   ;;  %s2676_s25 = scalar_lea.hbm %s2972_s1, 512 }
   0x3   :  { %s31_s22 = sshll.u32 %s2792_s21, 4  ;;  %p2677_p0 = scmp.ne.s32.totalorder %s2972_s1, %s2676_s25  ;;  %s32_s22 = int_to_ptr.vmem [resolvable:$true] %s31_s22 }
   0x4   :  { %p2680_p1 = scmp.lt.u32.totalorder %s2676_s25, %s2972_s1 }
   0x6   :  { %p2682_p2 = pnand %p2680_p1, %p2677_p0 }
   0x8   :  { %2685 = shalt.err (!%p2682_p2)
}
   0x9   :  { %s2686_s30 = scalar_lea.vmem %s32_s22, 512  ;;  %p2691_p4 = scmp.lt.s32.totalorder %s32_s22, %s32_s22 }
   0xa   :  { %p2687_p3 = scmp.ne.s32.totalorder %s32_s22, %s2686_s30  ;;  %p2692_p5 = scmp.lt.s32.totalorder %s2686_s30, %s2686_s30 }
   0xc   :  { %p2693_p6 = por %p2692_p5, %p2691_p4 }
   0xe   :  { %p2694_p7 = pnand %p2693_p6, %p2687_p3 }
  0x10   :  { %2697 = shalt.err (!%p2694_p7)
}
  0x11   :  { %s2793_s7 = smov 256   ;;  %s2794_s8 = smov 16  }
  0x12   :  { %37 = dma.hbm_to_vmem [thread:$0]  %s2972_s1, 512, %s32_s22, [#allocation5], %s2793_s7, %s2793_s7, %s2794_s8  }
  0x13   :  { %s2795_s11 = smov [#allocation7]   ;;  %s2698_s15 = scalar_lea.hbm %s2974_s3, 16384 }
  0x14   :  { %s55_s12 = sshll.u32 %s2795_s11, 4  ;;  %p2699_p8 = scmp.ne.s32.totalorder %s2974_s3, %s2698_s15  ;;  %s56_s12 = int_to_ptr.vmem [resolvable:$true] %s55_s12 }
  0x15   :  { %p2702_p9 = scmp.lt.u32.totalorder %s2698_s15, %s2974_s3 }
  0x17   :  { %p2704_p10 = pnand %p2702_p9, %p2699_p8 }
  0x19   :  { %2707 = shalt.err (!%p2704_p10)
}
  0x1a   :  { %s2708_s20 = scalar_lea.vmem %s56_s12, 16384  ;;  %p2713_p12 = scmp.lt.s32.totalorder %s56_s12, %s56_s12 }
  0x1b   :  { %p2709_p11 = scmp.ne.s32.totalorder %s56_s12, %s2708_s20  ;;  %p2714_p13 = scmp.lt.s32.totalorder %s2708_s20, %s2708_s20 }
  0x1d   :  { %p2715_p0 = por %p2714_p13, %p2713_p12 }
  0x1f   :  { %p2716_p1 = pnand %p2715_p0, %p2709_p11 }
  0x21   :  { %2719 = shalt.err (!%p2716_p1)
}
  0x22   :  { %s2796_s1 = smov 128   ;;  %s2797_s21 = smov 8  }
  0x23   :  { %61 = dma.hbm_to_vmem [thread:$0]  %s2974_s3, 16384, %s56_s12, [#allocation8], %s2796_s1, %s2796_s1, %s2797_s21  }
  0x24   :  { %s2798_s24 = smov [#allocation2]   ;;  %s2720_s28 = scalar_lea.hbm %s2971_s0, 1024 }
  0x25   :  { %s19_s25 = sshll.u32 %s2798_s24, 4  ;;  %p2721_p2 = scmp.ne.s32.totalorder %s2971_s0, %s2720_s28  ;;  %s20_s25 = int_to_ptr.vmem [resolvable:$true] %s19_s25 }
  0x26   :  { %p2724_p3 = scmp.lt.u32.totalorder %s2720_s28, %s2971_s0 }
  0x28   :  { %p2726_p4 = pnand %p2724_p3, %p2721_p2 }
  0x2a   :  { %2729 = shalt.err (!%p2726_p4)
}
  0x2b   :  { %s2730_s9 = scalar_lea.vmem %s20_s25, 1024  ;;  %p2735_p6 = scmp.lt.s32.totalorder %s20_s25, %s20_s25 }
  0x2c   :  { %p2731_p5 = scmp.ne.s32.totalorder %s20_s25, %s2730_s9  ;;  %p2736_p7 = scmp.lt.s32.totalorder %s2730_s9, %s2730_s9 }
  0x2e   :  { %p2737_p8 = por %p2736_p7, %p2735_p6 }
  0x30   :  { %p2738_p9 = pnand %p2737_p8, %p2731_p5 }
  0x32   :  { %2741 = shalt.err (!%p2738_p9)
}
  0x33   :  { %s2799_s3 = smov 512   ;;  %s2800_s10 = smov 32  }
  0x34   :  { %25 = dma.hbm_to_vmem [thread:$0]  %s2971_s0, 1024, %s20_s25, [#allocation3], %s2799_s3, %s2799_s3, %s2800_s10  }
  0x35   :  { %s2801_s13 = smov [#allocation6]   ;;  %s2742_s17 = scalar_lea.hbm %s2973_s2, 2048 }
  0x36   :  { %s43_s14 = sshll.u32 %s2801_s13, 4  ;;  %p2743_p10 = scmp.ne.s32.totalorder %s2973_s2, %s2742_s17  ;;  %s44_s14 = int_to_ptr.vmem [resolvable:$true] %s43_s14 }
  0x37   :  { %p2746_p11 = scmp.lt.u32.totalorder %s2742_s17, %s2973_s2 }
  0x39   :  { %p2748_p12 = pnand %p2746_p11, %p2743_p10 }
  0x3b   :  { %2751 = shalt.err (!%p2748_p12)
}
  0x3c   :  { %s2752_s21 = scalar_lea.vmem %s44_s14, 2048  ;;  %p2757_p0 = scmp.lt.s32.totalorder %s44_s14, %s44_s14 }
  0x3d   :  { %p2753_p13 = scmp.ne.s32.totalorder %s44_s14, %s2752_s21  ;;  %p2758_p1 = scmp.lt.s32.totalorder %s2752_s21, %s2752_s21 }
  0x3f   :  { %p2759_p2 = por %p2758_p1, %p2757_p0 }
  0x41   :  { %p2760_p3 = pnand %p2759_p2, %p2753_p13 }
  0x43   :  { %2763 = shalt.err (!%p2760_p3)
}
  0x44   :  { %s2802_s0 = smov 1024   ;;  %s2803_s22 = smov 64  }
  0x45   :  { %49 = dma.hbm_to_vmem [thread:$0]  %s2973_s2, 2048, %s44_s14, [#allocation5], %s2802_s0, %s2802_s0, %s2803_s22  }
  0x46   :  { %s2804_s25 = smov [#allocation9]   ;;  %s2764_s29 = scalar_lea.hbm %s2975_s4, 16384 }
  0x47   :  { %s67_s26 = sshll.u32 %s2804_s25, 4  ;;  %p2765_p4 = scmp.ne.s32.totalorder %s2975_s4, %s2764_s29  ;;  %s68_s26 = int_to_ptr.vmem [resolvable:$true] %s67_s26 }
  0x48   :  { %p2768_p5 = scmp.lt.u32.totalorder %s2764_s29, %s2975_s4 }
  0x4a   :  { %p2770_p6 = pnand %p2768_p5, %p2765_p4 }
  0x4c   :  { %2773 = shalt.err (!%p2770_p6)
}
  0x4d   :  { %s2774_s11 = scalar_lea.vmem %s68_s26, 16384  ;;  %p2779_p8 = scmp.lt.s32.totalorder %s68_s26, %s68_s26 }
  0x4e   :  { %p2775_p7 = scmp.ne.s32.totalorder %s68_s26, %s2774_s11  ;;  %p2780_p9 = scmp.lt.s32.totalorder %s2774_s11, %s2774_s11 }
  0x50   :  { %p2781_p10 = por %p2780_p9, %p2779_p8 }
  0x52   :  { %p2782_p11 = pnand %p2781_p10, %p2775_p7 }
  0x54   :  { %2785 = shalt.err (!%p2782_p11)
}
  0x55   :  { %73 = dma.hbm_to_vmem [thread:$0]  %s2975_s4, 16384, %s68_s26, [#allocation8], %s2799_s3, %s2799_s3, %s2800_s10  }
  0x56   :  { %2786 = dma.done.wait [#allocation3], 1024  }
  0x57   :  { %2787 = vsyncadd [#allocation3], 4294966272 }
  0x58   :  { %2788 = dma.done.wait [#allocation5], 2560  }
  0x59   :  { %2789 = vsyncadd [#allocation5], 4294964736 }
  0x5a   :  { %2790 = dma.done.wait [#allocation8], 32768  }
  0x5b   :  { %2791 = vsyncadd [#allocation8], 4294934528  ;;  %v2468_v0 = vld [vmem:[#allocation7 + $0x4] ss:$8 sps:$4 sm:$0xff]   ;;  %v2470_v1 = vld [vmem:[#allocation7] ss:$8 sps:$4 sm:$0xff]  }
  0x5c   :  { %911 = vmatprep.subr.bf16.mxu0 %v2468_v0  ;;  %v2471_v2 = vld [vmem:[#allocation7 + $0x14] ss:$8 sps:$4 sm:$0xff]   ;;  %v2473_v3 = vld [vmem:[#allocation7 + $0x10] ss:$8 sps:$4 sm:$0xff]   ;;  %v2474_v4 = vld [vmem:[#allocation7 + $0x24] ss:$8 sps:$4 sm:$0xff]  }
  0x5d   :  { %912 = vmatpush1.bf16.msra.mxu0 %v2470_v1  ;;  %v2476_v5 = vld [vmem:[#allocation7 + $0x20] ss:$8 sps:$4 sm:$0xff]   ;;  %v2477_v6 = vld [vmem:[#allocation7 + $0x34] ss:$8 sps:$4 sm:$0xff]   ;;  %v2479_v7 = vld [vmem:[#allocation7 + $0x30] ss:$8 sps:$4 sm:$0xff]  }
  0x5e   :  { %913 = vmatprep.subr.bf16.mxu0 %v2471_v2  ;;  %v2480_v8 = vld [vmem:[#allocation7 + $0x44] ss:$8 sps:$4 sm:$0xff]   ;;  %v2482_v9 = vld [vmem:[#allocation7 + $0x40] ss:$8 sps:$4 sm:$0xff]   ;;  %v2483_v10 = vld [vmem:[#allocation7 + $0x54] ss:$8 sps:$4 sm:$0xff]  }
  0x5f   :  { %v2485_v11 = vld [vmem:[#allocation7 + $0x50] ss:$8 sps:$4 sm:$0xff]   ;;  %v2486_v12 = vld [vmem:[#allocation7 + $0x64] ss:$8 sps:$4 sm:$0xff]   ;;  %v2488_v16 = vld [vmem:[#allocation7 + $0x60] ss:$8 sps:$4 sm:$0xff]  }
  0x60   :  { %v91_v13 = vld [vmem:[#allocation2] sm:$0xff]  ;;  %v2489_v17 = vld [vmem:[#allocation7 + $0x74] ss:$8 sps:$4 sm:$0xff]   ;;  %v2491_v18 = vld [vmem:[#allocation7 + $0x70] ss:$8 sps:$4 sm:$0xff]   ;;  %vm2161_vm0 = vcmask 7168  }
  0x61   :  { %914 = vmatpush1.bf16.msra.mxu0 %v2473_v3  ;;  %v95_v14 = vld [vmem:[#allocation2 + $0x20] sm:$0xff]  ;;  %v2495_v21 = vld [vmem:[#allocation7 + $0x94] ss:$8 sps:$4 sm:$0xff]   ;;  %v2497_v22 = vld [vmem:[#allocation7 + $0x90] ss:$8 sps:$4 sm:$0xff]  }
  0x62   :  { %915 = vmatprep.subr.bf16.mxu0 %v2474_v4  ;;  %v2172_v15 = vcombine.high %v91_v13, %v95_v14  ;;  %v2492_v19 = vld [vmem:[#allocation7 + $0x84] ss:$8 sps:$4 sm:$0xff]   ;;  %v2494_v20 = vld [vmem:[#allocation7 + $0x80] ss:$8 sps:$4 sm:$0xff]   ;;  %v2501_v25 = vld [vmem:[#allocation7 + $0xb4] ss:$8 sps:$4 sm:$0xff]   ;;  %v2171_v38 = vcombine.low %v91_v13, %v95_v14 }
  0x63   :  { %v2498_v23 = vld [vmem:[#allocation7 + $0xa4] ss:$8 sps:$4 sm:$0xff]   ;;  %v2500_v24 = vld [vmem:[#allocation7 + $0xa0] ss:$8 sps:$4 sm:$0xff]   ;;  %v2503_v26 = vld [vmem:[#allocation7 + $0xb0] ss:$8 sps:$4 sm:$0xff]  }
  0x64   :  { %943 = vmatprep.mubr.bf16.mxu0 %v2172_v15  ;;  %v2504_v27 = vld [vmem:[#allocation7 + $0xc4] ss:$8 sps:$4 sm:$0xff]   ;;  %v2506_v28 = vld [vmem:[#allocation7 + $0xc0] ss:$8 sps:$4 sm:$0xff]   ;;  %v2507_v29 = vld [vmem:[#allocation7 + $0xd4] ss:$8 sps:$4 sm:$0xff]  }
  0x65   :  { %916 = vmatpush1.bf16.msra.mxu0 %v2476_v5  ;;  %v2509_v30 = vld [vmem:[#allocation7 + $0xd0] ss:$8 sps:$4 sm:$0xff]   ;;  %v2510_v31 = vld [vmem:[#allocation7 + $0xe4] ss:$8 sps:$4 sm:$0xff]   ;;  %v2512_v32 = vld [vmem:[#allocation7 + $0xe0] ss:$8 sps:$4 sm:$0xff]  }
  0x66   :  { %917 = vmatprep.subr.bf16.mxu0 %v2477_v6  ;;  %v2513_v33 = vld [vmem:[#allocation7 + $0xf4] ss:$8 sps:$4 sm:$0xff]   ;;  %v2515_v34 = vld [vmem:[#allocation7 + $0xf0] ss:$8 sps:$4 sm:$0xff]   ;;  %v2518_v35 = vld [vmem:[#allocation7 + $0x104] ss:$8 sps:$4 sm:$0xff]  }
  0x67   :  { %v2906_v36 = vld [vmem:[#allocation2 + $0x8] sm:$0xff]  ;;  %v2521_v41 = vld [vmem:[#allocation7 + $0x114] ss:$8 sps:$4 sm:$0xff]   ;;  %v2519_v42 = vld [vmem:[#allocation7 + $0x110] ss:$8 sps:$4 sm:$0xff]  }
  0x68   :  { %v2908_v37 = vld [vmem:[#allocation2 + $0x28] sm:$0xff]  ;;  %v2527_v45 = vld [vmem:[#allocation7 + $0x134] ss:$8 sps:$4 sm:$0xff]   ;;  %v2525_v46 = vld [vmem:[#allocation7 + $0x130] ss:$8 sps:$4 sm:$0xff]  }
  0x69   :  { %918 = vmatpush1.bf16.msra.mxu0 %v2479_v7  ;;  %v2516_v39 = vld [vmem:[#allocation7 + $0x100] ss:$8 sps:$4 sm:$0xff]   ;;  %v2174_v40 = vcombine.high %v2906_v36, %v2908_v37  ;;  %v2524_v43 = vld [vmem:[#allocation7 + $0x124] ss:$8 sps:$4 sm:$0xff]   ;;  %v2533_v49 = vld [vmem:[#allocation7 + $0x154] ss:$8 sps:$4 sm:$0xff]  }
  0x6a   :  { %919 = vmatprep.subr.bf16.mxu0 %v2480_v8  ;;  %v2522_v44 = vld [vmem:[#allocation7 + $0x120] ss:$8 sps:$4 sm:$0xff]   ;;  %v2530_v47 = vld [vmem:[#allocation7 + $0x144] ss:$8 sps:$4 sm:$0xff]   ;;  %v2531_v50 = vld [vmem:[#allocation7 + $0x150] ss:$8 sps:$4 sm:$0xff]  }
  0x6b   :  { %v2528_v48 = vld [vmem:[#allocation7 + $0x140] ss:$8 sps:$4 sm:$0xff]   ;;  %v2536_v51 = vld [vmem:[#allocation7 + $0x164] ss:$8 sps:$4 sm:$0xff]   ;;  %v2539_v53 = vld [vmem:[#allocation7 + $0x174] ss:$8 sps:$4 sm:$0xff]  }
  0x6c   :  { %v2534_v52 = vld [vmem:[#allocation7 + $0x160] ss:$8 sps:$4 sm:$0xff]   ;;  %v2537_v54 = vld [vmem:[#allocation7 + $0x170] ss:$8 sps:$4 sm:$0xff]   ;;  %v2542_v55 = vld [vmem:[#allocation7 + $0x184] ss:$8 sps:$4 sm:$0xff]  }
  0x6d   :  { %920 = vmatpush1.bf16.msra.mxu0 %v2482_v9  ;;  %v2540_v56 = vld [vmem:[#allocation7 + $0x180] ss:$8 sps:$4 sm:$0xff]   ;;  %v2545_v57 = vld [vmem:[#allocation7 + $0x194] ss:$8 sps:$4 sm:$0xff]   ;;  %v2543_v58 = vld [vmem:[#allocation7 + $0x190] ss:$8 sps:$4 sm:$0xff]  }
  0x6e   :  { %921 = vmatprep.subr.bf16.mxu0 %v2483_v10  ;;  %v2548_v59 = vld [vmem:[#allocation7 + $0x1a4] ss:$8 sps:$4 sm:$0xff]   ;;  %v2546_v60 = vld [vmem:[#allocation7 + $0x1a0] ss:$8 sps:$4 sm:$0xff]   ;;  %v2551_v61 = vld [vmem:[#allocation7 + $0x1b4] ss:$8 sps:$4 sm:$0xff]   ;;  %v2173_v10 = vcombine.low %v2906_v36, %v2908_v37 }
  0x6f   :  { %v2549_v62 = vld [vmem:[#allocation7 + $0x1b0] ss:$8 sps:$4 sm:$0xff]   ;;  %v2554_v63 = vld [vmem:[#allocation7 + $0x1c4] ss:$8 sps:$4 sm:$0xff]   ;;  %v2552_v0 = vld [vmem:[#allocation7 + $0x1c0] ss:$8 sps:$4 sm:$0xff]  }
  0x70   :  { %v2557_v1 = vld [vmem:[#allocation7 + $0x1d4] ss:$8 sps:$4 sm:$0xff]   ;;  %v2555_v2 = vld [vmem:[#allocation7 + $0x1d0] ss:$8 sps:$4 sm:$0xff]   ;;  %v2560_v3 = vld [vmem:[#allocation7 + $0x1e4] ss:$8 sps:$4 sm:$0xff]  }
  0x71   :  { %922 = vmatpush1.bf16.msra.mxu0 %v2485_v11  ;;  %v2558_v4 = vld [vmem:[#allocation7 + $0x1e0] ss:$8 sps:$4 sm:$0xff]   ;;  %v2563_v5 = vld [vmem:[#allocation7 + $0x1f4] ss:$8 sps:$4 sm:$0xff]   ;;  %v2561_v6 = vld [vmem:[#allocation7 + $0x1f0] ss:$8 sps:$4 sm:$0xff]  }
  0x72   :  { %923 = vmatprep.subr.bf16.mxu0 %v2486_v12  ;;  %v2566_v7 = vld [vmem:[#allocation7 + $0x204] ss:$8 sps:$4 sm:$0xff]   ;;  %v2912_v8 = vld [vmem:[#allocation2 + $0x10] sm:$0xff]  ;;  %v2564_v11 = vld [vmem:[#allocation7 + $0x200] ss:$8 sps:$4 sm:$0xff]  }
  0x73   :  { %v2914_v9 = vld [vmem:[#allocation2 + $0x30] sm:$0xff]  ;;  %v1113_v14 = vld [vmem:[#allocation9] sm:$0xff] }
  0x74   :  { %v2176_v12 = vcombine.high %v2912_v8, %v2914_v9  ;;  %v2569_v13 = vld [vmem:[#allocation7 + $0x214] ss:$8 sps:$4 sm:$0xff]   ;;  %v1117_v15 = vld [vmem:[#allocation9 + $0x20] sm:$0xff] }
  0x75   :  { %924 = vmatpush1.bf16.msra.mxu0 %v2488_v16  ;;  %v1121_v16 = vld [vmem:[#allocation9 + $0x40] sm:$0xff] }
  0x76   :  { %925 = vmatprep.subr.bf16.mxu0 %v2489_v17  ;;  %v2567_v17 = vld [vmem:[#allocation7 + $0x210] ss:$8 sps:$4 sm:$0xff]   ;;  %v1149_v36 = vld [vmem:[#allocation9 + $0x120] sm:$0xff] }
  0x79   :  { %926 = vmatpush1.bf16.msra.mxu0 %v2491_v18  ;;  %v2312_v18 = vcombine.high %v1113_v14, %v1117_v15 }
  0x7a   :  { %927 = vmatprep.subr.bf16.mxu0 %v2492_v19  ;;  %v2311_v19 = vcombine.low %v1113_v14, %v1117_v15  ;;  %v2617_v15 = vld [vmem:[#allocation7 + $0x314] ss:$8 sps:$4 sm:$0xff]  }
  0x7b   :  { %1923 = vmatprep.subr.bf16.mxu1 %v2312_v18  ;;  %v2618_v18 = vld [vmem:[#allocation7 + $0x320] ss:$8 sps:$4 sm:$0xff]  }
  0x7c   :  { %1924 = vmatpush1.bf16.msra.mxu1 %v2311_v19  ;;  %v2623_v19 = vld [vmem:[#allocation7 + $0x334] ss:$8 sps:$4 sm:$0xff]  }
  0x7d   :  { %928 = vmatpush1.bf16.msra.mxu0 %v2494_v20  ;;  %v1125_v20 = vld [vmem:[#allocation9 + $0x60] sm:$0xff] }
  0x7e   :  { %929 = vmatprep.subr.bf16.mxu0 %v2495_v21  ;;  %v2572_v21 = vld [vmem:[#allocation7 + $0x224] ss:$8 sps:$4 sm:$0xff]  }
  0x81   :  { %930 = vmatpush1.bf16.msra.mxu0 %v2497_v22  ;;  %v2320_v22 = vcombine.high %v1121_v16, %v1125_v20 }
  0x82   :  { %931 = vmatprep.subr.bf16.mxu0 %v2498_v23  ;;  %v1129_v23 = vld [vmem:[#allocation9 + $0x80] sm:$0xff] }
  0x83   :  { %1925 = vmatprep.subr.bf16.mxu1 %v2320_v22  ;;  %v2627_v22 = vld [vmem:[#allocation7 + $0x350] ss:$8 sps:$4 sm:$0xff]  }
  0x85   :  { %932 = vmatpush1.bf16.msra.mxu0 %v2500_v24  ;;  %v1133_v24 = vld [vmem:[#allocation9 + $0xa0] sm:$0xff] }
  0x86   :  { %933 = vmatprep.subr.bf16.mxu0 %v2501_v25  ;;  %v2319_v25 = vcombine.low %v1121_v16, %v1125_v20  ;;  %v2615_v16 = vld [vmem:[#allocation7 + $0x310] ss:$8 sps:$4 sm:$0xff]  }
  0x87   :  { %v2621_v20 = vld [vmem:[#allocation7 + $0x330] ss:$8 sps:$4 sm:$0xff]  }
  0x88   :  { %1926 = vmatpush1.bf16.msra.mxu1 %v2319_v25  ;;  %v2635_v25 = vld [vmem:[#allocation7 + $0x374] ss:$8 sps:$4 sm:$0xff]  }
  0x89   :  { %934 = vmatpush1.bf16.msra.mxu0 %v2503_v26  ;;  %v2570_v26 = vld [vmem:[#allocation7 + $0x220] ss:$8 sps:$4 sm:$0xff]  }
  0x8a   :  { %935 = vmatprep.subr.bf16.mxu0 %v2504_v27  ;;  %v2328_v27 = vcombine.high %v1129_v23, %v1133_v24 }
  0x8c   :  { %1927 = vmatprep.subr.bf16.mxu1 %v2328_v27  ;;  %v2638_v27 = vld [vmem:[#allocation7 + $0x384] ss:$8 sps:$4 sm:$0xff]  }
  0x8d   :  { %936 = vmatpush1.bf16.msra.mxu0 %v2506_v28  ;;  %v2575_v28 = vld [vmem:[#allocation7 + $0x234] ss:$8 sps:$4 sm:$0xff]  }
  0x8e   :  { %937 = vmatprep.subr.bf16.mxu0 %v2507_v29  ;;  %v1137_v29 = vld [vmem:[#allocation9 + $0xc0] sm:$0xff] }
  0x91   :  { %938 = vmatpush1.bf16.msra.mxu0 %v2509_v30  ;;  %v1141_v30 = vld [vmem:[#allocation9 + $0xe0] sm:$0xff] }
  0x92   :  { %939 = vmatprep.subr.bf16.mxu0 %v2510_v31  ;;  %v2327_v31 = vcombine.low %v1129_v23, %v1133_v24  ;;  %v2335_v37 = vcombine.low %v1137_v29, %v1141_v30  ;;  %v2632_v23 = vld [vmem:[#allocation7 + $0x364] ss:$8 sps:$4 sm:$0xff]   ;;  %v2630_v24 = vld [vmem:[#allocation7 + $0x360] ss:$8 sps:$4 sm:$0xff]  }
  0x94   :  { %1928 = vmatpush1.bf16.msra.mxu1 %v2327_v31  ;;  %v2644_v31 = vld [vmem:[#allocation7 + $0x3a4] ss:$8 sps:$4 sm:$0xff]  }
  0x95   :  { %940 = vmatpush1.bf16.msra.mxu0 %v2512_v32  ;;  %v2573_v32 = vld [vmem:[#allocation7 + $0x230] ss:$8 sps:$4 sm:$0xff]  }
  0x96   :  { %941 = vmatprep.subr.bf16.mxu0 %v2513_v33  ;;  %v2336_v33 = vcombine.high %v1137_v29, %v1141_v30  ;;  %v2641_v29 = vld [vmem:[#allocation7 + $0x394] ss:$8 sps:$4 sm:$0xff]   ;;  %v2639_v30 = vld [vmem:[#allocation7 + $0x390] ss:$8 sps:$4 sm:$0xff]  }
  0x98   :  { %1929 = vmatprep.subr.bf16.mxu1 %v2336_v33  ;;  %v2647_v33 = vld [vmem:[#allocation7 + $0x3b4] ss:$8 sps:$4 sm:$0xff]  }
  0x99   :  { %942 = vmatpush1.bf16.msra.mxu0 %v2515_v34  ;;  %v2578_v34 = vld [vmem:[#allocation7 + $0x244] ss:$8 sps:$4 sm:$0xff]   ;;  %1930 = vmatpush1.bf16.msra.mxu1 %v2335_v37  ;;  %v2653_v37 = vld [vmem:[#allocation7 + $0x3d4] ss:$8 sps:$4 sm:$0xff]  }
  0x9a   :  { %954 = vmatprep.subr.bf16.mxu0 %v2518_v35  ;;  %v1145_v35 = vld [vmem:[#allocation9 + $0x100] sm:$0xff] }
  0x9c   :  { %944 = vmatmul.mubr.bf16.vlgmr.msra.gmra.mrb[0].mxu0 %v2171_v38  ;;  %v2576_v38 = vld [vmem:[#allocation7 + $0x240] ss:$8 sps:$4 sm:$0xff]  }
  0x9d   :  { %955 = vmatpush1.bf16.msra.mxu0 %v2516_v39  ;;  %986 = vmatprep.mubr.bf16.mxu0 %v2174_v40  ;;  %v2344_v39 = vcombine.high %v1145_v35, %v1149_v36  ;;  %v2581_v40 = vld [vmem:[#allocation7 + $0x254] ss:$8 sps:$4 sm:$0xff]  }
  0x9e   :  { %956 = vmatprep.subr.bf16.mxu0 %v2521_v41  ;;  %v1153_v41 = vld [vmem:[#allocation9 + $0x140] sm:$0xff] }
  0x9f   :  { %1931 = vmatprep.subr.bf16.mxu1 %v2344_v39  ;;  %v2656_v39 = vld [vmem:[#allocation7 + $0x3e4] ss:$8 sps:$4 sm:$0xff]  }
  0xa1   :  { %957 = vmatpush1.bf16.msra.mxu0 %v2519_v42  ;;  %v1157_v42 = vld [vmem:[#allocation9 + $0x160] sm:$0xff] }
  0xa2   :  { %958 = vmatprep.subr.bf16.mxu0 %v2524_v43  ;;  %v2343_v43 = vcombine.low %v1145_v35, %v1149_v36  ;;  %v2650_v35 = vld [vmem:[#allocation7 + $0x3c4] ss:$8 sps:$4 sm:$0xff]   ;;  %v2648_v36 = vld [vmem:[#allocation7 + $0x3c0] ss:$8 sps:$4 sm:$0xff]  }
  0xa4   :  { %1932 = vmatpush1.bf16.msra.mxu1 %v2343_v43 }
  0xa5   :  { %959 = vmatpush1.bf16.msra.mxu0 %v2522_v44  ;;  %v2579_v44 = vld [vmem:[#allocation7 + $0x250] ss:$8 sps:$4 sm:$0xff]  }
  0xa6   :  { %960 = vmatprep.subr.bf16.mxu0 %v2527_v45  ;;  %v2352_v45 = vcombine.high %v1153_v41, %v1157_v42 }
  0xa8   :  { %1933 = vmatprep.subr.bf16.mxu1 %v2352_v45  ;;  %v1173_v45 = vld [vmem:[#allocation9 + $0x1e0] sm:$0xff] }
  0xa9   :  { %961 = vmatpush1.bf16.msra.mxu0 %v2525_v46  ;;  %v2584_v46 = vld [vmem:[#allocation7 + $0x264] ss:$8 sps:$4 sm:$0xff]  }
  0xaa   :  { %962 = vmatprep.subr.bf16.mxu0 %v2530_v47  ;;  %v1161_v47 = vld [vmem:[#allocation9 + $0x180] sm:$0xff] }
  0xad   :  { %963 = vmatpush1.bf16.msra.mxu0 %v2528_v48  ;;  %v1165_v48 = vld [vmem:[#allocation9 + $0x1a0] sm:$0xff] }
  0xae   :  { %964 = vmatprep.subr.bf16.mxu0 %v2533_v49  ;;  %v2351_v49 = vcombine.low %v1153_v41, %v1157_v42  ;;  %v2659_v41 = vld [vmem:[#allocation7 + $0x3f4] ss:$8 sps:$4 sm:$0xff]   ;;  %v2657_v42 = vld [vmem:[#allocation7 + $0x3f0] ss:$8 sps:$4 sm:$0xff]  }
  0xb0   :  { %1934 = vmatpush1.bf16.msra.mxu1 %v2351_v49  ;;  %v1181_v49 = vld [vmem:[#allocation9 + $0x220] sm:$0xff] }
  0xb1   :  { %965 = vmatpush1.bf16.msra.mxu0 %v2531_v50  ;;  %v2582_v50 = vld [vmem:[#allocation7 + $0x260] ss:$8 sps:$4 sm:$0xff]  }
  0xb2   :  { %966 = vmatprep.subr.bf16.mxu0 %v2536_v51  ;;  %v2360_v51 = vcombine.high %v1161_v47, %v1165_v48 }
  0xb4   :  { %1935 = vmatprep.subr.bf16.mxu1 %v2360_v51 }
  0xb5   :  { %967 = vmatpush1.bf16.msra.mxu0 %v2534_v52  ;;  %v2587_v52 = vld [vmem:[#allocation7 + $0x274] ss:$8 sps:$4 sm:$0xff]  }
  0xb6   :  { %968 = vmatprep.subr.bf16.mxu0 %v2539_v53  ;;  %v2359_v53 = vcombine.low %v1161_v47, %v1165_v48  ;;  %v1177_v48 = vld [vmem:[#allocation9 + $0x200] sm:$0xff] }
  0xb7   :  { %v2375_v51 = vcombine.low %v1177_v48, %v1181_v49 }
  0xb8   :  { %1936 = vmatpush1.bf16.msra.mxu1 %v2359_v53  ;;  %v1189_v53 = vld [vmem:[#allocation9 + $0x260] sm:$0xff] }
  0xb9   :  { %969 = vmatpush1.bf16.msra.mxu0 %v2537_v54  ;;  %v2585_v54 = vld [vmem:[#allocation7 + $0x270] ss:$8 sps:$4 sm:$0xff]  }
  0xba   :  { %970 = vmatprep.subr.bf16.mxu0 %v2542_v55  ;;  %v2590_v55 = vld [vmem:[#allocation7 + $0x284] ss:$8 sps:$4 sm:$0xff]  }
  0xbd   :  { %971 = vmatpush1.bf16.msra.mxu0 %v2540_v56  ;;  %v2588_v56 = vld [vmem:[#allocation7 + $0x280] ss:$8 sps:$4 sm:$0xff]  }
  0xbe   :  { %972 = vmatprep.subr.bf16.mxu0 %v2545_v57  ;;  %v2593_v57 = vld [vmem:[#allocation7 + $0x294] ss:$8 sps:$4 sm:$0xff]  }
  0xc1   :  { %973 = vmatpush1.bf16.msra.mxu0 %v2543_v58  ;;  %v2591_v58 = vld [vmem:[#allocation7 + $0x290] ss:$8 sps:$4 sm:$0xff]  }
  0xc2   :  { %974 = vmatprep.subr.bf16.mxu0 %v2548_v59  ;;  %v2596_v59 = vld [vmem:[#allocation7 + $0x2a4] ss:$8 sps:$4 sm:$0xff]  }
  0xc5   :  { %975 = vmatpush1.bf16.msra.mxu0 %v2546_v60  ;;  %v2594_v60 = vld [vmem:[#allocation7 + $0x2a0] ss:$8 sps:$4 sm:$0xff]  }
  0xc6   :  { %976 = vmatprep.subr.bf16.mxu0 %v2551_v61  ;;  %v2599_v61 = vld [vmem:[#allocation7 + $0x2b4] ss:$8 sps:$4 sm:$0xff]  }
  0xc9   :  { %977 = vmatpush1.bf16.msra.mxu0 %v2549_v62  ;;  %v2597_v62 = vld [vmem:[#allocation7 + $0x2b0] ss:$8 sps:$4 sm:$0xff]  }
  0xca   :  { %978 = vmatprep.subr.bf16.mxu0 %v2554_v63  ;;  %v2602_v63 = vld [vmem:[#allocation7 + $0x2c4] ss:$8 sps:$4 sm:$0xff]  }
  0xcd   :  { %979 = vmatpush1.bf16.msra.mxu0 %v2552_v0  ;;  %v2600_v0 = vld [vmem:[#allocation7 + $0x2c0] ss:$8 sps:$4 sm:$0xff]  }
  0xce   :  { %980 = vmatprep.subr.bf16.mxu0 %v2557_v1  ;;  %v2605_v1 = vld [vmem:[#allocation7 + $0x2d4] ss:$8 sps:$4 sm:$0xff]  }
  0xd1   :  { %981 = vmatpush1.bf16.msra.mxu0 %v2555_v2  ;;  %v2603_v2 = vld [vmem:[#allocation7 + $0x2d0] ss:$8 sps:$4 sm:$0xff]  }
  0xd2   :  { %982 = vmatprep.subr.bf16.mxu0 %v2560_v3  ;;  %v2608_v3 = vld [vmem:[#allocation7 + $0x2e4] ss:$8 sps:$4 sm:$0xff]  }
  0xd5   :  { %983 = vmatpush1.bf16.msra.mxu0 %v2558_v4  ;;  %v2606_v4 = vld [vmem:[#allocation7 + $0x2e0] ss:$8 sps:$4 sm:$0xff]  }
  0xd6   :  { %984 = vmatprep.subr.bf16.mxu0 %v2563_v5  ;;  %v2611_v5 = vld [vmem:[#allocation7 + $0x2f4] ss:$8 sps:$4 sm:$0xff]  }
  0xd9   :  { %985 = vmatpush1.bf16.msra.mxu0 %v2561_v6  ;;  %v2609_v6 = vld [vmem:[#allocation7 + $0x2f0] ss:$8 sps:$4 sm:$0xff]  }
  0xda   :  { %997 = vmatprep.subr.bf16.mxu0 %v2566_v7  ;;  %v2614_v7 = vld [vmem:[#allocation7 + $0x304] ss:$8 sps:$4 sm:$0xff]  }
  0xdc   :  { %987 = vmatmul.mubr.bf16.vlgmr.msra.gmra.mrb[0].mxu0 %v2173_v10  ;;  %v2920_v10 = vld [vmem:[#allocation2 + $0x18] sm:$0xff] }
  0xdd   :  { %998 = vmatpush1.bf16.msra.mxu0 %v2564_v11  ;;  %1029 = vmatprep.mubr.bf16.mxu0 %v2176_v12  ;;  %v2922_v11 = vld [vmem:[#allocation2 + $0x38] sm:$0xff]  ;;  %v2175_v12 = vcombine.low %v2912_v8, %v2914_v9  ;;  %v2626_v8 = vld [vmem:[#allocation7 + $0x344] ss:$8 sps:$4 sm:$0xff]   ;;  %v2624_v9 = vld [vmem:[#allocation7 + $0x340] ss:$8 sps:$4 sm:$0xff]  }
  0xde   :  { %999 = vmatprep.subr.bf16.mxu0 %v2569_v13  ;;  %v2612_v13 = vld [vmem:[#allocation7 + $0x300] ss:$8 sps:$4 sm:$0xff]   ;;  %v2178_v14 = vcombine.high %v2920_v10, %v2922_v11  ;;  %v2177_v43 = vcombine.low %v2920_v10, %v2922_v11 }
  0xdf   :  { %v1225_v10 = vld [vmem:[#allocation9 + $0x380] sm:$0xff] }
  0xe0   :  { %v1229_v11 = vld [vmem:[#allocation9 + $0x3a0] sm:$0xff] }
  0xe1   :  { %1000 = vmatpush1.bf16.msra.mxu0 %v2567_v17  ;;  %v2620_v17 = vld [vmem:[#allocation7 + $0x324] ss:$8 sps:$4 sm:$0xff]  }
  0xe2   :  { %1001 = vmatprep.subr.bf16.mxu0 %v2572_v21  ;;  %v2629_v21 = vld [vmem:[#allocation7 + $0x354] ss:$8 sps:$4 sm:$0xff]  }
  0xe5   :  { %1002 = vmatpush1.bf16.msra.mxu0 %v2570_v26  ;;  %v2633_v26 = vld [vmem:[#allocation7 + $0x370] ss:$8 sps:$4 sm:$0xff]  }
  0xe6   :  { %1003 = vmatprep.subr.bf16.mxu0 %v2575_v28  ;;  %v2636_v28 = vld [vmem:[#allocation7 + $0x380] ss:$8 sps:$4 sm:$0xff]  }
  0xe9   :  { %1004 = vmatpush1.bf16.msra.mxu0 %v2573_v32  ;;  %v2642_v32 = vld [vmem:[#allocation7 + $0x3a0] ss:$8 sps:$4 sm:$0xff]  }
  0xea   :  { %1005 = vmatprep.subr.bf16.mxu0 %v2578_v34  ;;  %v2645_v34 = vld [vmem:[#allocation7 + $0x3b0] ss:$8 sps:$4 sm:$0xff]  }
  0xed   :  { %1006 = vmatpush1.bf16.msra.mxu0 %v2576_v38  ;;  %v2651_v38 = vld [vmem:[#allocation7 + $0x3d0] ss:$8 sps:$4 sm:$0xff]  }
  0xee   :  { %1007 = vmatprep.subr.bf16.mxu0 %v2581_v40  ;;  %v2654_v40 = vld [vmem:[#allocation7 + $0x3e0] ss:$8 sps:$4 sm:$0xff]  }
  0xf1   :  { %1008 = vmatpush1.bf16.msra.mxu0 %v2579_v44  ;;  %v1169_v44 = vld [vmem:[#allocation9 + $0x1c0] sm:$0xff] }
  0xf2   :  { %1009 = vmatprep.subr.bf16.mxu0 %v2584_v46  ;;  %v2368_v46 = vcombine.high %v1169_v44, %v1173_v45  ;;  %v2367_v47 = vcombine.low %v1169_v44, %v1173_v45 }
  0xf4   :  { %1937 = vmatprep.subr.bf16.mxu1 %v2368_v46 }
  0xf5   :  { %1010 = vmatpush1.bf16.msra.mxu0 %v2582_v50  ;;  %1938 = vmatpush1.bf16.msra.mxu1 %v2367_v47  ;;  %v2376_v50 = vcombine.high %v1177_v48, %v1181_v49 }
  0xf6   :  { %1011 = vmatprep.subr.bf16.mxu0 %v2587_v52  ;;  %v1185_v52 = vld [vmem:[#allocation9 + $0x240] sm:$0xff] }
  0xf7   :  { %1939 = vmatprep.subr.bf16.mxu1 %v2376_v50 }
  0xf9   :  { %1012 = vmatpush1.bf16.msra.mxu0 %v2585_v54  ;;  %1940 = vmatpush1.bf16.msra.mxu1 %v2375_v51  ;;  %v2384_v54 = vcombine.high %v1185_v52, %v1189_v53 }
  0xfa   :  { %1013 = vmatprep.subr.bf16.mxu0 %v2590_v55  ;;  %v2383_v55 = vcombine.low %v1185_v52, %v1189_v53  ;;  %v1122_v52 = vld [vmem:[#allocation9 + $0x48] sm:$0xff] }
  0xfb   :  { %1941 = vmatprep.subr.bf16.mxu1 %v2384_v54  ;;  %v1126_v53 = vld [vmem:[#allocation9 + $0x68] sm:$0xff] }
  0xfd   :  { %1014 = vmatpush1.bf16.msra.mxu0 %v2588_v56  ;;  %1942 = vmatpush1.bf16.msra.mxu1 %v2383_v55  ;;  %v1193_v56 = vld [vmem:[#allocation9 + $0x280] sm:$0xff] }
  0xfe   :  { %1015 = vmatprep.subr.bf16.mxu0 %v2593_v57  ;;  %v1197_v57 = vld [vmem:[#allocation9 + $0x2a0] sm:$0xff] }
 0x101   :  { %1016 = vmatpush1.bf16.msra.mxu0 %v2591_v58  ;;  %v2392_v58 = vcombine.high %v1193_v56, %v1197_v57 }
 0x102   :  { %1017 = vmatprep.subr.bf16.mxu0 %v2596_v59  ;;  %v2391_v59 = vcombine.low %v1193_v56, %v1197_v57  ;;  %v2322_v56 = vcombine.high %v1122_v52, %v1126_v53  ;;  %v1130_v57 = vld [vmem:[#allocation9 + $0x88] sm:$0xff] }
 0x103   :  { %1943 = vmatprep.subr.bf16.mxu1 %v2392_v58  ;;  %v1134_v58 = vld [vmem:[#allocation9 + $0xa8] sm:$0xff] }
 0x104   :  { %1944 = vmatpush1.bf16.msra.mxu1 %v2391_v59  ;;  %v2321_v59 = vcombine.low %v1122_v52, %v1126_v53  ;;  %v1123_v53 = vld [vmem:[#allocation9 + $0x50] sm:$0xff] }
 0x105   :  { %1018 = vmatpush1.bf16.msra.mxu0 %v2594_v60  ;;  %v1201_v60 = vld [vmem:[#allocation9 + $0x2c0] sm:$0xff] }
 0x106   :  { %1019 = vmatprep.subr.bf16.mxu0 %v2599_v61  ;;  %v1205_v61 = vld [vmem:[#allocation9 + $0x2e0] sm:$0xff] }
 0x109   :  { %1020 = vmatpush1.bf16.msra.mxu0 %v2597_v62  ;;  %v2400_v62 = vcombine.high %v1201_v60, %v1205_v61 }
 0x10a   :  { %1021 = vmatprep.subr.bf16.mxu0 %v2602_v63  ;;  %v2399_v63 = vcombine.low %v1201_v60, %v1205_v61  ;;  %v2330_v60 = vcombine.high %v1130_v57, %v1134_v58  ;;  %v1138_v61 = vld [vmem:[#allocation9 + $0xc8] sm:$0xff] }
 0x10b   :  { %1945 = vmatprep.subr.bf16.mxu1 %v2400_v62  ;;  %v1142_v62 = vld [vmem:[#allocation9 + $0xe8] sm:$0xff] }
 0x10c   :  { %1946 = vmatpush1.bf16.msra.mxu1 %v2399_v63  ;;  %v2329_v63 = vcombine.low %v1130_v57, %v1134_v58 }
 0x10d   :  { %1022 = vmatpush1.bf16.msra.mxu0 %v2600_v0  ;;  %v1209_v0 = vld [vmem:[#allocation9 + $0x300] sm:$0xff] }
 0x10e   :  { %1023 = vmatprep.subr.bf16.mxu0 %v2605_v1  ;;  %v1213_v1 = vld [vmem:[#allocation9 + $0x320] sm:$0xff] }
 0x111   :  { %1024 = vmatpush1.bf16.msra.mxu0 %v2603_v2  ;;  %v2408_v2 = vcombine.high %v1209_v0, %v1213_v1 }
 0x112   :  { %1025 = vmatprep.subr.bf16.mxu0 %v2608_v3  ;;  %v2407_v3 = vcombine.low %v1209_v0, %v1213_v1  ;;  %v2338_v0 = vcombine.high %v1138_v61, %v1142_v62  ;;  %v1146_v1 = vld [vmem:[#allocation9 + $0x108] sm:$0xff] }
 0x113   :  { %1947 = vmatprep.subr.bf16.mxu1 %v2408_v2  ;;  %v1150_v2 = vld [vmem:[#allocation9 + $0x128] sm:$0xff] }
 0x114   :  { %1948 = vmatpush1.bf16.msra.mxu1 %v2407_v3  ;;  %v2337_v3 = vcombine.low %v1138_v61, %v1142_v62 }
 0x115   :  { %1026 = vmatpush1.bf16.msra.mxu0 %v2606_v4  ;;  %v1217_v4 = vld [vmem:[#allocation9 + $0x340] sm:$0xff] }
 0x116   :  { %1027 = vmatprep.subr.bf16.mxu0 %v2611_v5  ;;  %v1221_v5 = vld [vmem:[#allocation9 + $0x360] sm:$0xff] }
 0x119   :  { %1028 = vmatpush1.bf16.msra.mxu0 %v2609_v6  ;;  %v2416_v6 = vcombine.high %v1217_v4, %v1221_v5 }
 0x11a   :  { %1040 = vmatprep.subr.bf16.mxu0 %v2614_v7  ;;  %v2415_v7 = vcombine.low %v1217_v4, %v1221_v5  ;;  %v2346_v4 = vcombine.high %v1146_v1, %v1150_v2  ;;  %v1154_v5 = vld [vmem:[#allocation9 + $0x148] sm:$0xff] }
 0x11b   :  { %1949 = vmatprep.subr.bf16.mxu1 %v2416_v6  ;;  %v1158_v6 = vld [vmem:[#allocation9 + $0x168] sm:$0xff] }
 0x11c   :  { %1030 = vmatmul.mubr.bf16.vlgmr.msra.gmra.mrb[0].mxu0 %v2175_v12  ;;  %1950 = vmatpush1.bf16.msra.mxu1 %v2415_v7  ;;  %v2424_v12 = vcombine.high %v1225_v10, %v1229_v11  ;;  %v2345_v7 = vcombine.low %v1146_v1, %v1150_v2 }
 0x11d   :  { %1041 = vmatpush1.bf16.msra.mxu0 %v2612_v13  ;;  %1072 = vmatprep.mubr.bf16.mxu0 %v2178_v14  ;;  %v2423_v13 = vcombine.low %v1225_v10, %v1229_v11  ;;  %v1233_v14 = vld [vmem:[#allocation9 + $0x3c0] sm:$0xff]  ;;  %v2354_v10 = vcombine.high %v1154_v5, %v1158_v6  ;;  %v1162_v11 = vld [vmem:[#allocation9 + $0x188] sm:$0xff] }
 0x11e   :  { %1042 = vmatprep.subr.bf16.mxu0 %v2617_v15  ;;  %1951 = vmatprep.subr.bf16.mxu1 %v2424_v12  ;;  %v1237_v15 = vld [vmem:[#allocation9 + $0x3e0] sm:$0xff]  ;;  %v1166_v12 = vld [vmem:[#allocation9 + $0x1a8] sm:$0xff] }
 0x120   :  { %1952 = vmatpush1.bf16.msra.mxu1 %v2423_v13  ;;  %v2353_v13 = vcombine.low %v1154_v5, %v1158_v6 }
 0x121   :  { %1043 = vmatpush1.bf16.msra.mxu0 %v2615_v16  ;;  %v2432_v16 = vcombine.high %v1233_v14, %v1237_v15 }
 0x122   :  { %1044 = vmatprep.subr.bf16.mxu0 %v2620_v17  ;;  %v2431_v17 = vcombine.low %v1233_v14, %v1237_v15  ;;  %v2362_v14 = vcombine.high %v1162_v11, %v1166_v12  ;;  %v1170_v15 = vld [vmem:[#allocation9 + $0x1c8] sm:$0xff] }
 0x123   :  { %1953 = vmatprep.subr.bf16.mxu1 %v2432_v16  ;;  %v1174_v16 = vld [vmem:[#allocation9 + $0x1e8] sm:$0xff] }
 0x124   :  { %1954 = vmatpush1.bf16.msra.mxu1 %v2431_v17  ;;  %v2361_v17 = vcombine.low %v1162_v11, %v1166_v12 }
 0x125   :  { %1045 = vmatpush1.bf16.msra.mxu0 %v2618_v18  ;;  %v1114_v18 = vld [vmem:[#allocation9 + $0x8] sm:$0xff] }
 0x126   :  { %1046 = vmatprep.subr.bf16.mxu0 %v2623_v19  ;;  %v1118_v19 = vld [vmem:[#allocation9 + $0x28] sm:$0xff] }
 0x129   :  { %1047 = vmatpush1.bf16.msra.mxu0 %v2621_v20  ;;  %v2314_v20 = vcombine.high %v1114_v18, %v1118_v19 }
 0x12a   :  { %1048 = vmatprep.subr.bf16.mxu0 %v2626_v8  ;;  %v2313_v8 = vcombine.low %v1114_v18, %v1118_v19  ;;  %v2370_v18 = vcombine.high %v1170_v15, %v1174_v16  ;;  %v1178_v19 = vld [vmem:[#allocation9 + $0x208] sm:$0xff] }
 0x12b   :  { %1966 = vmatprep.subr.bf16.mxu1 %v2314_v20  ;;  %v1182_v20 = vld [vmem:[#allocation9 + $0x228] sm:$0xff] }
 0x12d   :  { %1049 = vmatpush1.bf16.msra.mxu0 %v2624_v9  ;;  %v227_v9 = vld [vmem:[#allocation4] sm:$0xff] }
 0x12e   :  { %1050 = vmatprep.subr.bf16.mxu0 %v2629_v21  ;;  %v228_v21 = vld [vmem:[#allocation4 + $0x8] sm:$0xff] }
 0x131   :  { %1051 = vmatpush1.bf16.msra.mxu0 %v2627_v22 }
 0x132   :  { %1052 = vmatprep.subr.bf16.mxu0 %v2632_v23  ;;  %v229_v23 = vld [vmem:[#allocation4 + $0x10] sm:$0xff] }
 0x135   :  { %1053 = vmatpush1.bf16.msra.mxu0 %v2630_v24 }
 0x136   :  { %1054 = vmatprep.subr.bf16.mxu0 %v2635_v25 }
 0x139   :  { %1055 = vmatpush1.bf16.msra.mxu0 %v2633_v26  ;;  %v230_v26 = vld [vmem:[#allocation4 + $0x18] sm:$0xff] }
 0x13a   :  { %1056 = vmatprep.subr.bf16.mxu0 %v2638_v27 }
 0x13d   :  { %1057 = vmatpush1.bf16.msra.mxu0 %v2636_v28 }
 0x13e   :  { %1058 = vmatprep.subr.bf16.mxu0 %v2641_v29 }
 0x141   :  { %1059 = vmatpush1.bf16.msra.mxu0 %v2639_v30 }
 0x142   :  { %1060 = vmatprep.subr.bf16.mxu0 %v2644_v31 }
 0x145   :  { %1061 = vmatpush1.bf16.msra.mxu0 %v2642_v32 }
 0x146   :  { %1062 = vmatprep.subr.bf16.mxu0 %v2647_v33 }
 0x149   :  { %1063 = vmatpush1.bf16.msra.mxu0 %v2645_v34 }
 0x14a   :  { %1064 = vmatprep.subr.bf16.mxu0 %v2650_v35 }
 0x14d   :  { %1065 = vmatpush1.bf16.msra.mxu0 %v2648_v36 }
 0x14e   :  { %1066 = vmatprep.subr.bf16.mxu0 %v2653_v37 }
 0x151   :  { %1067 = vmatpush1.bf16.msra.mxu0 %v2651_v38 }
 0x152   :  { %1068 = vmatprep.subr.bf16.mxu0 %v2656_v39 }
 0x155   :  { %1069 = vmatpush1.bf16.msra.mxu0 %v2654_v40 }
 0x156   :  { %1070 = vmatprep.subr.bf16.mxu0 %v2659_v41 }
 0x159   :  { %1071 = vmatpush1.bf16.msra.mxu0 %v2657_v42 }
 0x15c   :  { %1073 = vmatmul.mubr.bf16.vlgmr.msra.gmra.mrb[0].mxu0 %v2177_v43 }
 0x22f   :  { %v1074_v22 = vpop.f32.mrb[0].mxu0 }
 0x230   :  { %v2439_v24 = vadd.f32 %v1074_v22, %v227_v9  ;;  %v1076_v25 = vpop.f32.mrb[1].mxu0  ;;  %v2378_v9 = vcombine.high %v1178_v19, %v1182_v20  ;;  %v1190_v22 = vld [vmem:[#allocation9 + $0x268] sm:$0xff] }
 0x231   :  { %v2440_v27 = vadd.f32 %v1076_v25, %v228_v21  ;;  %v1078_v28 = vpop.f32.mrb[2].mxu0  ;;  %v1186_v21 = vld [vmem:[#allocation9 + $0x248] sm:$0xff] }
 0x232   :  { %v2307_v29 = vmul.f32 -1.442695, %v2439_v24  ;;  %v2441_v30 = vadd.f32 %v1078_v28, %v229_v23  ;;  %v1080_v31 = vpop.f32.mrb[3].mxu0  ;;  %v2377_v23 = vcombine.low %v1178_v19, %v1182_v20  ;;  %v1194_v25 = vld [vmem:[#allocation9 + $0x288] sm:$0xff] }
 0x233   :  { %v2308_v32 = vmul.f32 -1.442695, %v2440_v27  ;;  %v2442_v33 = vadd.f32 %v1080_v31, %v230_v26  ;;  %v1198_v26 = vld [vmem:[#allocation9 + $0x2a8] sm:$0xff] }
 0x234   :  { %2660 = vpow2.f32 %v2307_v29  ;;  %v2309_v34 = vmul.f32 -1.442695, %v2441_v30  ;;  %v2394_v28 = vcombine.high %v1194_v25, %v1198_v26  ;;  %v1202_v29 = vld [vmem:[#allocation9 + $0x2c8] sm:$0xff]  ;;  %v2393_v31 = vcombine.low %v1194_v25, %v1198_v26 }
 0x235   :  { %2662 = vpow2.f32 %v2308_v32  ;;  %v2310_v35 = vmul.f32 -1.442695, %v2442_v33 }
 0x236   :  { %2664 = vpow2.f32 %v2309_v34  ;;  %v1214_v34 = vld [vmem:[#allocation9 + $0x328] sm:$0xff] }
 0x237   :  { %2666 = vpow2.f32 %v2310_v35 }
 0x23e   :  { %v2661_v36 = vpop.eup %2660 }
 0x23f   :  { %v2663_v37 = vpop.eup %2662  ;;  %v1095_v38 = vadd.f32 1.0, %v2661_v36 }
 0x240   :  { %v2665_v39 = vpop.eup %2664  ;;  %v1096_v40 = vadd.f32 1.0, %v2663_v37  ;;  %v1218_v37 = vld [vmem:[#allocation9 + $0x348] sm:$0xff] }
 0x241   :  { %v2667_v41 = vpop.eup %2666  ;;  %2668 = vrcp.f32 %v1095_v38  ;;  %v1097_v42 = vadd.f32 1.0, %v2665_v39  ;;  %v1222_v38 = vld [vmem:[#allocation9 + $0x368] sm:$0xff] }
 0x242   :  { %2670 = vrcp.f32 %v1096_v40  ;;  %v1098_v43 = vadd.f32 1.0, %v2667_v41  ;;  %v2418_v40 = vcombine.high %v1218_v37, %v1222_v38  ;;  %v1226_v41 = vld [vmem:[#allocation9 + $0x388] sm:$0xff] }
 0x243   :  { %2672 = vrcp.f32 %v1097_v42  ;;  %v1230_v42 = vld [vmem:[#allocation9 + $0x3a8] sm:$0xff] }
 0x244   :  { %2674 = vrcp.f32 %v1098_v43  ;;  %v2417_v43 = vcombine.low %v1218_v37, %v1222_v38 }
 0x24b   :  { %v2669_v44 = vpop.eup %2668 }
 0x24c   :  { %v2671_v45 = vpop.eup %2670  ;;  %v1107_v48 = vmul.f32 %v2669_v44, %v2439_v24  ;;  %v2386_v24 = vcombine.high %v1186_v21, %v1190_v22  ;;  %v2426_v44 = vcombine.high %v1226_v41, %v1230_v42 }
 0x24d   :  { %v2673_v46 = vpop.eup %2672  ;;  %v1108_v50 = vmul.f32 %v2671_v45, %v2440_v27  ;;  %v2385_v27 = vcombine.low %v1186_v21, %v1190_v22  ;;  %v1234_v45 = vld [vmem:[#allocation9 + $0x3c8] sm:$0xff] }
 0x24e   :  { %v2675_v47 = vpop.eup %2674  ;;  %v1109_v49 = vmul.f32 %v2673_v46, %v2441_v30  ;;  %v1206_v30 = vld [vmem:[#allocation9 + $0x2e8] sm:$0xff] }
 0x24f   :  { %v1110_v51 = vmul.f32 %v2675_v47, %v2442_v33  ;;  %v2402_v32 = vcombine.high %v1202_v29, %v1206_v30  ;;  %v1210_v33 = vld [vmem:[#allocation9 + $0x308] sm:$0xff]  ;;  %v2401_v35 = vcombine.low %v1202_v29, %v1206_v30  ;;  %v2425_v47 = vcombine.low %v1226_v41, %v1230_v42 }
 0x250   :  { %v2930_v54 = vpack.c.bf16 %v1109_v49, %v1107_v48  ;;  %v2410_v36 = vcombine.high %v1210_v33, %v1214_v34  ;;  %v2409_v39 = vcombine.low %v1210_v33, %v1214_v34  ;;  %v1238_v46 = vld [vmem:[#allocation9 + $0x3e8] sm:$0xff]  ;;  %v1115_v49 = vld [vmem:[#allocation9 + $0x10] sm:$0xff] }
 0x251   :  { %v2932_v55 = vpack.c.bf16 %v1110_v51, %v1108_v50  ;;  %v2434_v48 = vcombine.high %v1234_v45, %v1238_v46  ;;  %v1119_v50 = vld [vmem:[#allocation9 + $0x30] sm:$0xff]  ;;  %v2433_v51 = vcombine.low %v1234_v45, %v1238_v46 }
 0x252   :  { %v2316_v52 = vcombine.high %v1115_v49, %v1119_v50  ;;  %v2315_v57 = vcombine.low %v1115_v49, %v1119_v50 }
 0x253   :  { %1955 = vmatprep.mubr.bf16.mxu1 %v2932_v55 }
 0x254   :  { %1956 = vmatmul.mubr.bf16.vlgmr.msra.gmra.mrb[0].mxu1 %v2930_v54 }
 0x255   :  { %1967 = vmatpush1.bf16.msra.mxu1 %v2313_v8  ;;  %1998 = vmatprep.mubr.bf16.mxu1 %v2932_v55  ;;  %v2369_v8 = vcombine.low %v1170_v15, %v1174_v16 }
 0x256   :  { %1968 = vmatprep.subr.bf16.mxu1 %v2322_v56  ;;  %v1127_v56 = vld [vmem:[#allocation9 + $0x70] sm:$0xff] }
 0x257   :  { %v2324_v58 = vcombine.high %v1123_v53, %v1127_v56  ;;  %v2323_v61 = vcombine.low %v1123_v53, %v1127_v56 }
 0x259   :  { %1969 = vmatpush1.bf16.msra.mxu1 %v2321_v59  ;;  %v1131_v59 = vld [vmem:[#allocation9 + $0x90] sm:$0xff] }
 0x25a   :  { %1970 = vmatprep.subr.bf16.mxu1 %v2330_v60  ;;  %v1135_v60 = vld [vmem:[#allocation9 + $0xb0] sm:$0xff] }
 0x25b   :  { %v2332_v62 = vcombine.high %v1131_v59, %v1135_v60  ;;  %v2331_v1 = vcombine.low %v1131_v59, %v1135_v60 }
 0x25d   :  { %1971 = vmatpush1.bf16.msra.mxu1 %v2329_v63  ;;  %v1139_v63 = vld [vmem:[#allocation9 + $0xd0] sm:$0xff] }
 0x25e   :  { %1972 = vmatprep.subr.bf16.mxu1 %v2338_v0  ;;  %v1143_v0 = vld [vmem:[#allocation9 + $0xf0] sm:$0xff] }
 0x25f   :  { %v2340_v2 = vcombine.high %v1139_v63, %v1143_v0  ;;  %v2339_v5 = vcombine.low %v1139_v63, %v1143_v0 }
 0x261   :  { %1973 = vmatpush1.bf16.msra.mxu1 %v2337_v3  ;;  %v1147_v3 = vld [vmem:[#allocation9 + $0x110] sm:$0xff] }
 0x262   :  { %1974 = vmatprep.subr.bf16.mxu1 %v2346_v4  ;;  %v1151_v4 = vld [vmem:[#allocation9 + $0x130] sm:$0xff] }
 0x263   :  { %v2348_v6 = vcombine.high %v1147_v3, %v1151_v4  ;;  %v2347_v11 = vcombine.low %v1147_v3, %v1151_v4 }
 0x265   :  { %1975 = vmatpush1.bf16.msra.mxu1 %v2345_v7  ;;  %v1155_v7 = vld [vmem:[#allocation9 + $0x150] sm:$0xff] }
 0x266   :  { %1976 = vmatprep.subr.bf16.mxu1 %v2354_v10  ;;  %v1159_v10 = vld [vmem:[#allocation9 + $0x170] sm:$0xff] }
 0x267   :  { %v2356_v12 = vcombine.high %v1155_v7, %v1159_v10  ;;  %v2355_v15 = vcombine.low %v1155_v7, %v1159_v10 }
 0x269   :  { %1977 = vmatpush1.bf16.msra.mxu1 %v2353_v13  ;;  %v1163_v13 = vld [vmem:[#allocation9 + $0x190] sm:$0xff] }
 0x26a   :  { %1978 = vmatprep.subr.bf16.mxu1 %v2362_v14  ;;  %v1167_v14 = vld [vmem:[#allocation9 + $0x1b0] sm:$0xff] }
 0x26b   :  { %v2364_v16 = vcombine.high %v1163_v13, %v1167_v14  ;;  %v2363_v19 = vcombine.low %v1163_v13, %v1167_v14  ;;  %v1164_v14 = vld [vmem:[#allocation9 + $0x198] sm:$0xff] }
 0x26d   :  { %1979 = vmatpush1.bf16.msra.mxu1 %v2361_v17  ;;  %v1171_v17 = vld [vmem:[#allocation9 + $0x1d0] sm:$0xff] }
 0x26e   :  { %1980 = vmatprep.subr.bf16.mxu1 %v2370_v18  ;;  %v1175_v18 = vld [vmem:[#allocation9 + $0x1f0] sm:$0xff] }
 0x26f   :  { %v2372_v20 = vcombine.high %v1171_v17, %v1175_v18  ;;  %v2371_v21 = vcombine.low %v1171_v17, %v1175_v18  ;;  %v1172_v18 = vld [vmem:[#allocation9 + $0x1d8] sm:$0xff] }
 0x271   :  { %1981 = vmatpush1.bf16.msra.mxu1 %v2369_v8  ;;  %v1179_v8 = vld [vmem:[#allocation9 + $0x210] sm:$0xff] }
 0x272   :  { %1982 = vmatprep.subr.bf16.mxu1 %v2378_v9  ;;  %v1183_v9 = vld [vmem:[#allocation9 + $0x230] sm:$0xff] }
 0x273   :  { %v2380_v22 = vcombine.high %v1179_v8, %v1183_v9  ;;  %v2379_v25 = vcombine.low %v1179_v8, %v1183_v9  ;;  %v1180_v9 = vld [vmem:[#allocation9 + $0x218] sm:$0xff] }
 0x275   :  { %1983 = vmatpush1.bf16.msra.mxu1 %v2377_v23  ;;  %v1187_v23 = vld [vmem:[#allocation9 + $0x250] sm:$0xff] }
 0x276   :  { %1984 = vmatprep.subr.bf16.mxu1 %v2386_v24  ;;  %v1191_v24 = vld [vmem:[#allocation9 + $0x270] sm:$0xff] }
 0x277   :  { %v2388_v26 = vcombine.high %v1187_v23, %v1191_v24  ;;  %v2387_v29 = vcombine.low %v1187_v23, %v1191_v24  ;;  %v1188_v24 = vld [vmem:[#allocation9 + $0x258] sm:$0xff] }
 0x279   :  { %1985 = vmatpush1.bf16.msra.mxu1 %v2385_v27  ;;  %v1195_v27 = vld [vmem:[#allocation9 + $0x290] sm:$0xff] }
 0x27a   :  { %1986 = vmatprep.subr.bf16.mxu1 %v2394_v28  ;;  %v1199_v28 = vld [vmem:[#allocation9 + $0x2b0] sm:$0xff] }
 0x27b   :  { %v2396_v30 = vcombine.high %v1195_v27, %v1199_v28  ;;  %v2395_v33 = vcombine.low %v1195_v27, %v1199_v28  ;;  %v1196_v28 = vld [vmem:[#allocation9 + $0x298] sm:$0xff] }
 0x27d   :  { %1987 = vmatpush1.bf16.msra.mxu1 %v2393_v31  ;;  %v1203_v31 = vld [vmem:[#allocation9 + $0x2d0] sm:$0xff] }
 0x27e   :  { %1988 = vmatprep.subr.bf16.mxu1 %v2402_v32  ;;  %v1207_v32 = vld [vmem:[#allocation9 + $0x2f0] sm:$0xff] }
 0x27f   :  { %v2404_v34 = vcombine.high %v1203_v31, %v1207_v32  ;;  %v2403_v37 = vcombine.low %v1203_v31, %v1207_v32  ;;  %v1204_v32 = vld [vmem:[#allocation9 + $0x2d8] sm:$0xff] }
 0x281   :  { %1989 = vmatpush1.bf16.msra.mxu1 %v2401_v35  ;;  %v1211_v35 = vld [vmem:[#allocation9 + $0x310] sm:$0xff] }
 0x282   :  { %1990 = vmatprep.subr.bf16.mxu1 %v2410_v36  ;;  %v1215_v36 = vld [vmem:[#allocation9 + $0x330] sm:$0xff] }
 0x283   :  { %v2412_v38 = vcombine.high %v1211_v35, %v1215_v36  ;;  %v2411_v41 = vcombine.low %v1211_v35, %v1215_v36  ;;  %v1212_v36 = vld [vmem:[#allocation9 + $0x318] sm:$0xff] }
 0x285   :  { %1991 = vmatpush1.bf16.msra.mxu1 %v2409_v39  ;;  %v1219_v39 = vld [vmem:[#allocation9 + $0x350] sm:$0xff] }
 0x286   :  { %1992 = vmatprep.subr.bf16.mxu1 %v2418_v40  ;;  %v1223_v40 = vld [vmem:[#allocation9 + $0x370] sm:$0xff] }
 0x287   :  { %v2420_v42 = vcombine.high %v1219_v39, %v1223_v40  ;;  %v2419_v45 = vcombine.low %v1219_v39, %v1223_v40  ;;  %v1220_v40 = vld [vmem:[#allocation9 + $0x358] sm:$0xff] }
 0x289   :  { %1993 = vmatpush1.bf16.msra.mxu1 %v2417_v43  ;;  %v1227_v43 = vld [vmem:[#allocation9 + $0x390] sm:$0xff] }
 0x28a   :  { %1994 = vmatprep.subr.bf16.mxu1 %v2426_v44  ;;  %v1231_v44 = vld [vmem:[#allocation9 + $0x3b0] sm:$0xff] }
 0x28b   :  { %v2428_v46 = vcombine.high %v1227_v43, %v1231_v44  ;;  %v2427_v49 = vcombine.low %v1227_v43, %v1231_v44  ;;  %v1228_v44 = vld [vmem:[#allocation9 + $0x398] sm:$0xff] }
 0x28d   :  { %1995 = vmatpush1.bf16.msra.mxu1 %v2425_v47  ;;  %v1235_v47 = vld [vmem:[#allocation9 + $0x3d0] sm:$0xff] }
 0x28e   :  { %1996 = vmatprep.subr.bf16.mxu1 %v2434_v48  ;;  %v1239_v48 = vld [vmem:[#allocation9 + $0x3f0] sm:$0xff] }
 0x28f   :  { %v2436_v50 = vcombine.high %v1235_v47, %v1239_v48  ;;  %v2435_v53 = vcombine.low %v1235_v47, %v1239_v48  ;;  %v1236_v48 = vld [vmem:[#allocation9 + $0x3d8] sm:$0xff] }
 0x291   :  { %1997 = vmatpush1.bf16.msra.mxu1 %v2433_v51  ;;  %v1116_v51 = vld [vmem:[#allocation9 + $0x18] sm:$0xff] }
 0x292   :  { %2009 = vmatprep.subr.bf16.mxu1 %v2316_v52  ;;  %v1120_v52 = vld [vmem:[#allocation9 + $0x38] sm:$0xff] }
 0x293   :  { %v2318_v56 = vcombine.high %v1116_v51, %v1120_v52  ;;  %v2317_v59 = vcombine.low %v1116_v51, %v1120_v52 }
 0x294   :  { %1999 = vmatmul.mubr.bf16.vlgmr.msra.gmra.mrb[4].mxu1 %v2930_v54 }
 0x295   :  { %2010 = vmatpush1.bf16.msra.mxu1 %v2315_v57  ;;  %2041 = vmatprep.mubr.bf16.mxu1 %v2932_v55  ;;  %v1124_v57 = vld [vmem:[#allocation9 + $0x58] sm:$0xff] }
 0x296   :  { %2011 = vmatprep.subr.bf16.mxu1 %v2324_v58  ;;  %v1128_v58 = vld [vmem:[#allocation9 + $0x78] sm:$0xff] }
 0x297   :  { %v2326_v60 = vcombine.high %v1124_v57, %v1128_v58  ;;  %v2325_v63 = vcombine.low %v1124_v57, %v1128_v58  ;;  %v2948_v58 = vld [vmem:[%s2976_s5] sm:$0xff] }
 0x299   :  { %2012 = vmatpush1.bf16.msra.mxu1 %v2323_v61  ;;  %v1132_v61 = vld [vmem:[#allocation9 + $0x98] sm:$0xff] }
 0x29a   :  { %2013 = vmatprep.subr.bf16.mxu1 %v2332_v62  ;;  %v1136_v62 = vld [vmem:[#allocation9 + $0xb8] sm:$0xff] }
 0x29b   :  { %v2334_v0 = vcombine.high %v1132_v61, %v1136_v62  ;;  %v2333_v3 = vcombine.low %v1132_v61, %v1136_v62 }
 0x29d   :  { %2014 = vmatpush1.bf16.msra.mxu1 %v2331_v1  ;;  %v1140_v1 = vld [vmem:[#allocation9 + $0xd8] sm:$0xff] }
 0x29e   :  { %2015 = vmatprep.subr.bf16.mxu1 %v2340_v2  ;;  %v1144_v2 = vld [vmem:[#allocation9 + $0xf8] sm:$0xff] }
 0x29f   :  { %v2342_v4 = vcombine.high %v1140_v1, %v1144_v2  ;;  %v2341_v7 = vcombine.low %v1140_v1, %v1144_v2  ;;  %v2096_v1 = vld [vmem:[#allocation6 + $0x8] sm:$0xff] }
 0x2a1   :  { %2016 = vmatpush1.bf16.msra.mxu1 %v2339_v5  ;;  %v1148_v5 = vld [vmem:[#allocation9 + $0x118] sm:$0xff] }
 0x2a2   :  { %2017 = vmatprep.subr.bf16.mxu1 %v2348_v6  ;;  %v1152_v6 = vld [vmem:[#allocation9 + $0x138] sm:$0xff] }
 0x2a3   :  { %v2350_v10 = vcombine.high %v1148_v5, %v1152_v6  ;;  %v2349_v13 = vcombine.low %v1148_v5, %v1152_v6 }
 0x2a5   :  { %2018 = vmatpush1.bf16.msra.mxu1 %v2347_v11  ;;  %v1156_v11 = vld [vmem:[#allocation9 + $0x158] sm:$0xff] }
 0x2a6   :  { %2019 = vmatprep.subr.bf16.mxu1 %v2356_v12  ;;  %v1160_v12 = vld [vmem:[#allocation9 + $0x178] sm:$0xff] }
 0x2a9   :  { %2020 = vmatpush1.bf16.msra.mxu1 %v2355_v15  ;;  %v1168_v15 = vld [vmem:[#allocation9 + $0x1b8] sm:$0xff] }
 0x2aa   :  { %2021 = vmatprep.subr.bf16.mxu1 %v2364_v16  ;;  %v2357_v16 = vcombine.low %v1156_v11, %v1160_v12  ;;  %v2366_v17 = vcombine.high %v1164_v14, %v1168_v15 }
 0x2ad   :  { %2022 = vmatpush1.bf16.msra.mxu1 %v2363_v19  ;;  %v1176_v19 = vld [vmem:[#allocation9 + $0x1f8] sm:$0xff] }
 0x2ae   :  { %2023 = vmatprep.subr.bf16.mxu1 %v2372_v20  ;;  %v2365_v20 = vcombine.low %v1164_v14, %v1168_v15  ;;  %v2374_v8 = vcombine.high %v1172_v18, %v1176_v19 }
 0x2b1   :  { %2024 = vmatpush1.bf16.msra.mxu1 %v2371_v21  ;;  %v1184_v21 = vld [vmem:[#allocation9 + $0x238] sm:$0xff] }
 0x2b2   :  { %2025 = vmatprep.subr.bf16.mxu1 %v2380_v22  ;;  %v2373_v22 = vcombine.low %v1172_v18, %v1176_v19  ;;  %v2382_v23 = vcombine.high %v1180_v9, %v1184_v21 }
 0x2b5   :  { %2026 = vmatpush1.bf16.msra.mxu1 %v2379_v25  ;;  %v1192_v25 = vld [vmem:[#allocation9 + $0x278] sm:$0xff] }
 0x2b6   :  { %2027 = vmatprep.subr.bf16.mxu1 %v2388_v26  ;;  %v2381_v26 = vcombine.low %v1180_v9, %v1184_v21  ;;  %v2390_v27 = vcombine.high %v1188_v24, %v1192_v25 }
 0x2b9   :  { %2028 = vmatpush1.bf16.msra.mxu1 %v2387_v29  ;;  %v1200_v29 = vld [vmem:[#allocation9 + $0x2b8] sm:$0xff] }
 0x2ba   :  { %2029 = vmatprep.subr.bf16.mxu1 %v2396_v30  ;;  %v2389_v30 = vcombine.low %v1188_v24, %v1192_v25  ;;  %v2398_v31 = vcombine.high %v1196_v28, %v1200_v29 }
 0x2bd   :  { %2030 = vmatpush1.bf16.msra.mxu1 %v2395_v33  ;;  %v1208_v33 = vld [vmem:[#allocation9 + $0x2f8] sm:$0xff] }
 0x2be   :  { %2031 = vmatprep.subr.bf16.mxu1 %v2404_v34  ;;  %v2397_v34 = vcombine.low %v1196_v28, %v1200_v29  ;;  %v2406_v35 = vcombine.high %v1204_v32, %v1208_v33  ;;  %v2105_v29 = vld [vmem:[#allocation6 + $0x50] sm:$0xff] }
 0x2c1   :  { %2032 = vmatpush1.bf16.msra.mxu1 %v2403_v37  ;;  %v1216_v37 = vld [vmem:[#allocation9 + $0x338] sm:$0xff] }
 0x2c2   :  { %2033 = vmatprep.subr.bf16.mxu1 %v2412_v38  ;;  %v2405_v38 = vcombine.low %v1204_v32, %v1208_v33  ;;  %v2414_v39 = vcombine.high %v1212_v36, %v1216_v37  ;;  %v2106_v33 = vld [vmem:[#allocation6 + $0x58] sm:$0xff] }
 0x2c5   :  { %2034 = vmatpush1.bf16.msra.mxu1 %v2411_v41  ;;  %v1224_v41 = vld [vmem:[#allocation9 + $0x378] sm:$0xff] }
 0x2c6   :  { %2035 = vmatprep.subr.bf16.mxu1 %v2420_v42  ;;  %v2413_v42 = vcombine.low %v1212_v36, %v1216_v37  ;;  %v2422_v43 = vcombine.high %v1220_v40, %v1224_v41 }
 0x2c9   :  { %2036 = vmatpush1.bf16.msra.mxu1 %v2419_v45  ;;  %v1232_v45 = vld [vmem:[#allocation9 + $0x3b8] sm:$0xff] }
 0x2ca   :  { %2037 = vmatprep.subr.bf16.mxu1 %v2428_v46  ;;  %v2421_v46 = vcombine.low %v1220_v40, %v1224_v41  ;;  %v2430_v47 = vcombine.high %v1228_v44, %v1232_v45 }
 0x2cd   :  { %2038 = vmatpush1.bf16.msra.mxu1 %v2427_v49  ;;  %v1240_v49 = vld [vmem:[#allocation9 + $0x3f8] sm:$0xff] }
 0x2ce   :  { %2039 = vmatprep.subr.bf16.mxu1 %v2436_v50  ;;  %v2429_v50 = vcombine.low %v1228_v44, %v1232_v45  ;;  %v2438_v51 = vcombine.high %v1236_v48, %v1240_v49  ;;  %v2437_v52 = vcombine.low %v1236_v48, %v1240_v49 }
 0x2d1   :  { %2040 = vmatpush1.bf16.msra.mxu1 %v2435_v53  ;;  %v1243_v53 = vlaneseq }
 0x2d2   :  { %2052 = vmatprep.subr.bf16.mxu1 %v2318_v56 }
 0x2d3   :  { %v2942_v56 = vshrl.u32 %v1243_v53, 7 }
 0x2d4   :  { %2042 = vmatmul.mubr.bf16.vlgmr.msra.gmra.mrb[8].mxu1 %v2930_v54 }
 0x2d5   :  { %2053 = vmatpush1.bf16.msra.mxu1 %v2317_v59  ;;  %2084 = vmatprep.mubr.bf16.mxu1 %v2932_v55  ;;  %v2358_v55 = vcombine.high %v1156_v11, %v1160_v12  ;;  %v1245_v57 = vsub.s32 0, %v2942_v56  ;;  %v1249_v59 = vsub.s32 1, %v2942_v56 }
 0x2d6   :  { %2054 = vmatprep.subr.bf16.mxu1 %v2326_v60 }
 0x2d7   :  { %v1246_v60 = vrot.slane %v2948_v58, %v1245_v57  ;;  %v1250_v61 = vrot.slane %v2948_v58, %v1249_v59  ;;  %v2100_v57 = vld [vmem:[#allocation6 + $0x28] sm:$0xff] }
 0x2d9   :  { %2055 = vmatpush1.bf16.msra.mxu1 %v2325_v63  ;;  %v2095_v63 = vld [vmem:[#allocation6] sm:$0xff] }
 0x2da   :  { %2056 = vmatprep.subr.bf16.mxu1 %v2334_v0 }
 0x2dd   :  { %2057 = vmatpush1.bf16.msra.mxu1 %v2333_v3 }
 0x2de   :  { %2058 = vmatprep.subr.bf16.mxu1 %v2342_v4  ;;  %v2103_v4 = vld [vmem:[#allocation6 + $0x40] sm:$0xff] }
 0x2e1   :  { %2059 = vmatpush1.bf16.msra.mxu1 %v2341_v7 }
 0x2e2   :  { %2060 = vmatprep.subr.bf16.mxu1 %v2350_v10  ;;  %v2104_v10 = vld [vmem:[#allocation6 + $0x48] sm:$0xff] }
 0x2e5   :  { %2061 = vmatpush1.bf16.msra.mxu1 %v2349_v13 }
 0x2e6   :  { %2062 = vmatprep.subr.bf16.mxu1 %v2358_v55 }
 0x2e9   :  { %2063 = vmatpush1.bf16.msra.mxu1 %v2357_v16 }
 0x2ea   :  { %2064 = vmatprep.subr.bf16.mxu1 %v2366_v17 }
 0x2ed   :  { %2065 = vmatpush1.bf16.msra.mxu1 %v2365_v20  ;;  %v1253_v20 = vsub.s32 2, %v2942_v56 }
 0x2ee   :  { %2066 = vmatprep.subr.bf16.mxu1 %v2374_v8  ;;  %v1257_v8 = vsub.s32 3, %v2942_v56 }
 0x2ef   :  { %v1254_v9 = vrot.slane %v2948_v58, %v1253_v20 }
 0x2f0   :  { %v1258_v21 = vrot.slane %v2948_v58, %v1257_v8 }
 0x2f1   :  { %2067 = vmatpush1.bf16.msra.mxu1 %v2373_v22 }
 0x2f2   :  { %2068 = vmatprep.subr.bf16.mxu1 %v2382_v23  ;;  %v2097_v23 = vld [vmem:[#allocation6 + $0x10] sm:$0xff] }
 0x2f5   :  { %2069 = vmatpush1.bf16.msra.mxu1 %v2381_v26  ;;  %v2098_v26 = vld [vmem:[#allocation6 + $0x18] sm:$0xff] }
 0x2f6   :  { %2070 = vmatprep.subr.bf16.mxu1 %v2390_v27 }
 0x2f9   :  { %2071 = vmatpush1.bf16.msra.mxu1 %v2389_v30 }
 0x2fa   :  { %2072 = vmatprep.subr.bf16.mxu1 %v2398_v31 }
 0x2fd   :  { %2073 = vmatpush1.bf16.msra.mxu1 %v2397_v34 }
 0x2fe   :  { %2074 = vmatprep.subr.bf16.mxu1 %v2406_v35 }
 0x301   :  { %2075 = vmatpush1.bf16.msra.mxu1 %v2405_v38 }
 0x302   :  { %2076 = vmatprep.subr.bf16.mxu1 %v2414_v39 }
 0x305   :  { %2077 = vmatpush1.bf16.msra.mxu1 %v2413_v42 }
 0x306   :  { %2078 = vmatprep.subr.bf16.mxu1 %v2422_v43 }
 0x309   :  { %2079 = vmatpush1.bf16.msra.mxu1 %v2421_v46  ;;  %v1261_v46 = vsub.s32 4, %v2942_v56 }
 0x30a   :  { %2080 = vmatprep.subr.bf16.mxu1 %v2430_v47  ;;  %v1265_v47 = vsub.s32 5, %v2942_v56 }
 0x30b   :  { %v1262_v48 = vrot.slane %v2948_v58, %v1261_v46 }
 0x30c   :  { %v1266_v49 = vrot.slane %v2948_v58, %v1265_v47 }
 0x30d   :  { %2081 = vmatpush1.bf16.msra.mxu1 %v2429_v50 }
 0x30e   :  { %2082 = vmatprep.subr.bf16.mxu1 %v2438_v51  ;;  %v2099_v51 = vld [vmem:[#allocation6 + $0x20] sm:$0xff] }
 0x311   :  { %2083 = vmatpush1.bf16.msra.mxu1 %v2437_v52 }
 0x314   :  { %2085 = vmatmul.mubr.bf16.vlgmr.msra.gmra.mrb[12].mxu1 %v2930_v54 }
 0x327   :  { %v1957_v62 = vpop.f32.mrb[0].mxu1 }
 0x328   :  { %v1958_v0 = vadd.f32 %v1957_v62, %v1246_v60  ;;  %v1959_v54 = vpop.f32.mrb[1].mxu1 }
 0x329   :  { %v1960_v2 = vadd.f32 %v1959_v54, %v1250_v61  ;;  %v1961_v3 = vpop.f32.mrb[2].mxu1  ;;  %v2108_v54 = vld [vmem:[#allocation6 + $0x68] sm:$0xff] }
 0x32a   :  { %v2111_v5 = vsub.f32 %v2095_v63, %v1958_v0  ;;  %v1962_v6 = vadd.f32 %v1961_v3, %v1246_v60  ;;  %v1963_v7 = vpop.f32.mrb[3].mxu1 }
 0x32b   :  { %v2112_v11 = vsub.f32 %v2096_v1, %v1960_v2  ;;  %v1964_v12 = vadd.f32 %v1963_v7, %v1250_v61  ;;  %v2107_v61 = vld [vmem:[#allocation6 + $0x60] sm:$0xff] }
 0x32c   :  { %v2127_v13 = vmul.f32 %v2111_v5, %v2111_v5  ;;  %v2119_v55 = vsub.f32 %v2103_v4, %v1962_v6 }
 0x32d   :  { %v2128_v14 = vmul.f32 %v2112_v11, %v2112_v11  ;;  %v2120_v15 = vsub.f32 %v2104_v10, %v1964_v12 }
 0x32e   :  { %v2135_v16 = vmul.f32 %v2119_v55, %v2119_v55 }
 0x32f   :  { %v2143_v17 = vadd.f32 %v2128_v14, %v2127_v13  ;;  %v2136_v18 = vmul.f32 %v2120_v15, %v2120_v15  ;;  %v1269_v14 = vsub.s32 6, %v2942_v56  ;;  %v1273_v15 = vsub.s32 7, %v2942_v56 }
 0x331   :  { %v2152_v19 = vadd.f32 %v2136_v18, %v2135_v16  ;;  %v1270_v16 = vrot.slane %v2948_v58, %v1269_v14 }
 0x367   :  { %v2000_v22 = vpop.f32.mrb[4].mxu1 }
 0x368   :  { %v2001_v24 = vadd.f32 %v2000_v22, %v1254_v9  ;;  %v2002_v25 = vpop.f32.mrb[5].mxu1 }
 0x369   :  { %v2003_v27 = vadd.f32 %v2002_v25, %v1258_v21  ;;  %v2004_v28 = vpop.f32.mrb[6].mxu1 }
 0x36a   :  { %v2113_v30 = vsub.f32 %v2097_v23, %v2001_v24  ;;  %v2005_v31 = vadd.f32 %v2004_v28, %v1254_v9  ;;  %v2006_v32 = vpop.f32.mrb[7].mxu1  ;;  %v2102_v9 = vld [vmem:[#allocation6 + $0x38] sm:$0xff]  ;;  %v2109_v23 = vld [vmem:[#allocation6 + $0x70] sm:$0xff] }
 0x36b   :  { %v2114_v34 = vsub.f32 %v2098_v26, %v2003_v27  ;;  %v2007_v35 = vadd.f32 %v2006_v32, %v1258_v21  ;;  %v2110_v27 = vld [vmem:[#allocation6 + $0x78] sm:$0xff] }
 0x36c   :  { %v2129_v36 = vmul.f32 %v2113_v30, %v2113_v30  ;;  %v2121_v37 = vsub.f32 %v2105_v29, %v2005_v31 }
 0x36d   :  { %v2130_v38 = vmul.f32 %v2114_v34, %v2114_v34  ;;  %v2122_v39 = vsub.f32 %v2106_v33, %v2007_v35 }
 0x36e   :  { %v2144_v40 = vadd.f32 %v2143_v17, %v2129_v36  ;;  %v2137_v41 = vmul.f32 %v2121_v37, %v2121_v37  ;;  %v1274_v17 = vrot.slane %v2948_v58, %v1273_v15 }
 0x36f   :  { %v2138_v42 = vmul.f32 %v2122_v39, %v2122_v39 }
 0x370   :  { %v2145_v43 = vadd.f32 %v2144_v40, %v2130_v38  ;;  %v2153_v44 = vadd.f32 %v2152_v19, %v2137_v41  ;;  %v2101_v19 = vld [vmem:[#allocation6 + $0x30] sm:$0xff] }
 0x372   :  { %v2154_v45 = vadd.f32 %v2153_v44, %v2138_v42 }
 0x3a7   :  { %v2043_v50 = vpop.f32.mrb[8].mxu1 }
 0x3a8   :  { %v2044_v52 = vadd.f32 %v2043_v50, %v1262_v48  ;;  %v2045_v53 = vpop.f32.mrb[9].mxu1 }
 0x3a9   :  { %v2046_v59 = vadd.f32 %v2045_v53, %v1266_v49  ;;  %v2047_v60 = vpop.f32.mrb[10].mxu1 }
 0x3aa   :  { %v2115_v62 = vsub.f32 %v2099_v51, %v2044_v52  ;;  %v2048_v63 = vadd.f32 %v2047_v60, %v1262_v48  ;;  %v2049_v0 = vpop.f32.mrb[11].mxu1 }
 0x3ab   :  { %v2116_v1 = vsub.f32 %v2100_v57, %v2046_v59  ;;  %v2050_v2 = vadd.f32 %v2049_v0, %v1266_v49 }
 0x3ac   :  { %v2131_v3 = vmul.f32 %v2115_v62, %v2115_v62  ;;  %v2123_v4 = vsub.f32 %v2107_v61, %v2048_v63 }
 0x3ad   :  { %v2132_v5 = vmul.f32 %v2116_v1, %v2116_v1  ;;  %v2124_v6 = vsub.f32 %v2108_v54, %v2050_v2 }
 0x3ae   :  { %v2146_v7 = vadd.f32 %v2145_v43, %v2131_v3  ;;  %v2139_v10 = vmul.f32 %v2123_v4, %v2123_v4 }
 0x3af   :  { %v2140_v11 = vmul.f32 %v2124_v6, %v2124_v6 }
 0x3b0   :  { %v2155_v12 = vadd.f32 %v2154_v45, %v2139_v10  ;;  %v2147_v13 = vadd.f32 %v2146_v7, %v2132_v5 }
 0x3b2   :  { %v2156_v55 = vadd.f32 %v2155_v12, %v2140_v11 }
 0x3e7   :  { %v2086_v18 = vpop.f32.mrb[12].mxu1 }
 0x3e8   :  { %v2087_v20 = vadd.f32 %v2086_v18, %v1270_v16  ;;  %v2088_v8 = vpop.f32.mrb[13].mxu1 }
 0x3e9   :  { %v2089_v21 = vadd.f32 %v2088_v8, %v1274_v17  ;;  %v2090_v22 = vpop.f32.mrb[14].mxu1 }
 0x3ea   :  { %v2117_v24 = vsub.f32 %v2101_v19, %v2087_v20  ;;  %v2091_v25 = vadd.f32 %v2090_v22, %v1270_v16  ;;  %v2092_v26 = vpop.f32.mrb[15].mxu1 }
 0x3eb   :  { %v2093_v28 = vadd.f32 %v2092_v26, %v1274_v17  ;;  %v2118_v29 = vsub.f32 %v2102_v9, %v2089_v21 }
 0x3ec   :  { %v2133_v30 = vmul.f32 %v2117_v24, %v2117_v24  ;;  %v2125_v56 = vsub.f32 %v2109_v23, %v2091_v25 }
 0x3ed   :  { %v2126_v31 = vsub.f32 %v2110_v27, %v2093_v28  ;;  %v2134_v32 = vmul.f32 %v2118_v29, %v2118_v29 }
 0x3ee   :  { %v2141_v33 = vmul.f32 %v2125_v56, %v2125_v56  ;;  %v2148_v58 = vadd.f32 %v2147_v13, %v2133_v30 }
 0x3ef   :  { %v2142_v34 = vmul.f32 %v2126_v31, %v2126_v31 }
 0x3f0   :  { %v2149_v35 = vadd.f32 %v2148_v58, %v2134_v32  ;;  %v2157_v36 = vadd.f32 %v2156_v55, %v2141_v33 }
 0x3f2   :  { %2150 = vadd.xlane.f32.xlu0 %v2149_v35  ;;  %v2158_v37 = vadd.f32 %v2157_v36, %v2142_v34 }
 0x3f6   :  { %2159 = vadd.xlane.f32.xlu0 %v2158_v37 }
 0x47f   :  { %v2151_v38 = vpop.xlane.xlu0 %2150 }
 0x480   :  { %2162 = vst.msk [vmem:[%s2977_s6] sm:$0xff] %vm2161_vm0, %v2151_v38 }
 0x483   :  { %v2160_v39 = vpop.xlane.xlu0 %2159 }
 0x484   :  { %2163 = vst.msk [vmem:[%s2977_s6 + $0x8] sm:$0xff] %vm2161_vm0, %v2160_v39 }
 0x485   :  { %2168 = vsyncpa [#allocation3], 1 }
 0x486   :  { %2169 = vsyncpa [#allocation5], 1 }
 0x487   :  { %2170 = vsyncpa [#allocation8], 1 }

</bundles_post_ra>
